<compile_context>
chip_gen: v6e
topology: v6e:2x2x1
jax: 0.10.0
libtpu: 0.0.40
codegen_flags: <defaults>
</compile_context>

<pallas_src>
import functools

import jax
import jax.numpy as jnp
from jax import lax
from jax.experimental import pallas as pl
from jax.experimental.pallas import tpu as pltpu

_EPS = 1e-5


# ------------------------------ chip / VMEM gating ----------------------------
def _vmem_limit_bytes():
    """~3/4 of per-TensorCore physical VMEM (64 MiB on v7x, 128 MiB v5e/v6e)."""
    cap = 64 * 1024 * 1024                      # conservative fallback (v7x/TC)
    try:
        cap = int(getattr(pltpu.get_tpu_info(), "vmem_capacity_bytes", cap))
    except Exception:
        pass
    return max(32 * 1024 * 1024, min((cap * 3) // 4, 112 * 1024 * 1024))


def _fused_vmem_bytes(n, cpi, cpm, cp4):
    """Upper-bound estimate of the fused kernel's VMEM working set (bytes)."""
    rows = 9 * n
    ins = 2 * 2 * (rows * cpi + cpi * cpm + 9 * cpm * cpm + cpm * cp4 + cpi * cp4)
    outs = 2 * 2 * rows * cp4
    scratch = rows * cpm * 2 + rows * cp4 * 4
    live = rows * cpm * 4 + rows * cp4 * 4 + n * (cpm + cp4) * 4   # f32 temps
    return ins + outs + scratch + live


# --------------------------------- fused kernel -------------------------------
def _make_fused_kernel(n, use_conv1d):
    rows = 9 * n

    def kernel(x_ref, w1_ref, w2_ref, w3_ref,
               g1_ref, be1_ref, g2_ref, be2_ref, g3_ref, be3_ref,
               *rest):
        if use_conv1d:
            wd_ref, bd_ref, o_ref, z1_ref, sc_ref = rest
        else:
            o_ref, z1_ref, sc_ref = rest

        x = x_ref[...]                                          # (9n, Cpi) bf16

        # ---- conv1 (1x1) + shortcut: two MXU ops sharing the same x tile -----
        h1 = jnp.dot(x, w1_ref[...], preferred_element_type=jnp.float32)
        if use_conv1d:
            sc_ref[...] = (jnp.dot(x, wd_ref[...],
                                   preferred_element_type=jnp.float32)
                           + bd_ref[...])
        else:
            # identity shortcut (only valid when in_channels == 4*out_channels)
            sc_ref[...] = x.astype(jnp.float32)

        # ---- BN1 (training mode, exact two-pass on resident f32) + ReLU ------
        inv1 = 1.0 / rows
        mu1 = jnp.sum(h1, axis=0, keepdims=True) * inv1
        d1 = h1 - mu1
        var1 = jnp.sum(d1 * d1, axis=0, keepdims=True) * inv1
        z1 = jnp.maximum(d1 * (g1_ref[...] * lax.rsqrt(var1 + _EPS))
                         + be1_ref[...], 0.0)
        z1_ref[...] = z1.astype(jnp.bfloat16)

        # ---- conv2 (3x3 VALID -> 1x1): 9 accumulating MXU taps ----------------
        # Row slab p of z1 holds spatial tap p of every image; w2_ref[p] is the
        # matching (Cpm, Cpm) HWIO slice -> no in-kernel relayout needed.
        h2 = jnp.dot(z1_ref[pl.ds(0, n), :], w2_ref[0],
                     preferred_element_type=jnp.float32)
        for p in range(1, 9):                                    # static unroll
            h2 = h2 + jnp.dot(z1_ref[pl.ds(p * n, n), :], w2_ref[p],
                              preferred_element_type=jnp.float32)

        # ---- BN2 + ReLU -------------------------------------------------------
        inv2 = 1.0 / n
        mu2 = jnp.sum(h2, axis=0, keepdims=True) * inv2
        d2 = h2 - mu2
        var2 = jnp.sum(d2 * d2, axis=0, keepdims=True) * inv2
        z2 = jnp.maximum(d2 * (g2_ref[...] * lax.rsqrt(var2 + _EPS))
                         + be2_ref[...], 0.0)

        # ---- conv3 (1x1) + BN3 -------------------------------------------------
        h3 = jnp.dot(z2.astype(jnp.bfloat16), w3_ref[...],
                     preferred_element_type=jnp.float32)         # (n, Cp4)
        mu3 = jnp.sum(h3, axis=0, keepdims=True) * inv2
        d3 = h3 - mu3
        var3 = jnp.sum(d3 * d3, axis=0, keepdims=True) * inv2
        fx = d3 * (g3_ref[...] * lax.rsqrt(var3 + _EPS)) + be3_ref[...]

        # ---- residual add (Fx broadcasts over the 9 pixels) + ReLU, bf16 store -
        for p in range(9):                                       # static unroll
            o_ref[pl.ds(p * n, n), :] = jnp.maximum(
                fx + sc_ref[pl.ds(p * n, n), :], 0.0).astype(o_ref.dtype)

    return kernel


# --------------------------------- helpers ------------------------------------
def _rup128(c):
    return ((c + 127) // 128) * 128


def _pad2(m, r, c):
    return jnp.pad(m, ((0, r - m.shape[0]), (0, c - m.shape[1])))


def _padvec(v, c):
    return jnp.pad(jnp.reshape(v, (1, -1)).astype(jnp.float32),
                   ((0, 0), (0, c - v.size)))


# --------------------------------- forward ------------------------------------
def deep_residual_block(x_nchw, params, *, strides=1, use_conv1d=True):
    """Forward of DeepResidualBlock (training-mode BN). I/O are NCHW (PyTorch)."""
    x = jnp.transpose(x_nchw, (0, 2, 3, 1)).astype(jnp.float32)   # NCHW -> NHWC
    if strides > 1:
        x = x[:, ::strides, ::strides, :]     # 1x1 conv with stride == subsample
    n, h, w, cin = x.shape
    cmid = params["w1"].shape[1]
    c4 = params["w3"].shape[1]
    # conv2 has kernel 3 and NO padding, so the residual add only broadcasts
    # (exactly as in PyTorch) when the post-stride feature map is 3x3 -> 1x1.
    assert h == 3 and w == 3, (
        "DeepResidualBlock only type-checks (in PyTorch too) when the "
        f"post-stride spatial size is 3x3; got {h}x{w}")
    if not use_conv1d:
        assert cin == c4, "identity shortcut needs in_channels == 4*out_channels"

    cpi, cpm, cp4 = _rup128(cin), _rup128(cmid), _rup128(c4)
    rows = 9 * n

    limit = _vmem_limit_bytes()
    est = _fused_vmem_bytes(n, cpi, cpm, cp4)
    # TODO(synk): add a tiled two-sweep (stats pass + apply pass) fallback for
    # batches whose fused working set exceeds the per-TensorCore VMEM budget.
    assert est <= limit, f"fused working set {est}B exceeds VMEM budget {limit}B"

    # ---- wrapper-side layout plumbing (pads / pixel-major flatten; XLA) -------
    # Pixel-major flatten: rows [p*n, (p+1)*n) hold spatial tap p of every image.
    x_pm = jnp.transpose(x.reshape(n, 9, cin), (1, 0, 2)).reshape(rows, cin)
    x2d = _pad2(x_pm, rows, cpi).astype(jnp.bfloat16)

    w1 = _pad2(params["w1"], cpi, cpm).astype(jnp.bfloat16)
    w2 = jnp.pad(params["w2"], ((0, 0), (0, 0), (0, cpm - cmid), (0, cpm - cmid)))
    w2 = w2.reshape(9, cpm, cpm).astype(jnp.bfloat16)              # HWIO taps
    w3 = _pad2(params["w3"], cpm, cp4).astype(jnp.bfloat16)
    g1, be1 = _padvec(params["g1"], cpm), _padvec(params["be1"], cpm)
    g2, be2 = _padvec(params["g2"], cpm), _padvec(params["be2"], cpm)
    g3, be3 = _padvec(params["g3"], cp4), _padvec(params["be3"], cp4)
    # Conv biases b1/b2/b3 are dropped: a per-channel constant added before a
    # training-mode BatchNorm is cancelled exactly by its mean subtraction.
    # TODO(synk): restore b1/b2/b3 if eval-mode (running-stats) BN is added.

    inputs = [x2d, w1, w2, w3, g1, be1, g2, be2, g3, be3]
    in_specs = [
        pl.BlockSpec((rows, cpi), lambda i: (0, 0)),
        pl.BlockSpec((cpi, cpm), lambda i: (0, 0)),
        pl.BlockSpec((9, cpm, cpm), lambda i: (0, 0, 0)),
        pl.BlockSpec((cpm, cp4), lambda i: (0, 0)),
        pl.BlockSpec((1, cpm), lambda i: (0, 0)),
        pl.BlockSpec((1, cpm), lambda i: (0, 0)),
        pl.BlockSpec((1, cpm), lambda i: (0, 0)),
        pl.BlockSpec((1, cpm), lambda i: (0, 0)),
        pl.BlockSpec((1, cp4), lambda i: (0, 0)),
        pl.BlockSpec((1, cp4), lambda i: (0, 0)),
    ]
    if use_conv1d:
        wd = _pad2(params["wd"], cpi, cp4).astype(jnp.bfloat16)
        bd = _padvec(params["bd"], cp4)
        inputs += [wd, bd]
        in_specs += [pl.BlockSpec((cpi, cp4), lambda i: (0, 0)),
                     pl.BlockSpec((1, cp4), lambda i: (0, 0))]

    flops = (2 * rows * cpi * cpm + 2 * n * 9 * cpm * cpm + 2 * n * cpm * cp4
             + (2 * rows * cpi * cp4 if use_conv1d else 0)
             + 12 * rows * max(cpm, cp4))
    bytes_acc = (2 * (rows * (cpi + cp4) + cpi * cpm + 9 * cpm * cpm + cpm * cp4
                      + (cpi * cp4 if use_conv1d else 0))
                 + 4 * 8 * max(cpm, cp4))

    out2d = pl.pallas_call(
        _make_fused_kernel(n, use_conv1d),
        grid=(1,),
        in_specs=in_specs,
        out_specs=pl.BlockSpec((rows, cp4), lambda i: (0, 0)),
        out_shape=jax.ShapeDtypeStruct((rows, cp4), jnp.bfloat16),
        scratch_shapes=[pltpu.VMEM((rows, cpm), jnp.bfloat16),   # z1 (post BN1+ReLU)
                        pltpu.VMEM((rows, cp4), jnp.float32)],   # shortcut
        compiler_params=pltpu.CompilerParams(
            dimension_semantics=("arbitrary",),
            vmem_limit_bytes=limit),
        cost_estimate=pl.CostEstimate(flops=int(flops),
                                      transcendentals=int(3 * cp4),
                                      bytes_accessed=int(bytes_acc)),
    )(*inputs)

    # pixel-major (9, n, Cp4) -> NHWC -> NCHW; slice off channel padding.
    out = out2d.reshape(9, n, cp4)[:, :, :c4].astype(jnp.float32)
    out = jnp.transpose(out, (1, 0, 2)).reshape(n, 3, 3, c4)
    return jnp.transpose(out, (0, 3, 1, 2))                       # NHWC -> NCHW


# ----------------------------- pure-JAX reference -----------------------------
def reference_forward(x_nchw, p, *, strides=1, use_conv1d=True):
    x = jnp.transpose(x_nchw, (0, 2, 3, 1)).astype(jnp.float32)
    if strides > 1:
        x = x[:, ::strides, ::strides, :]

    def bn(h, g, b):
        mu = jnp.mean(h, axis=(0, 1, 2), keepdims=True)
        var = jnp.mean((h - mu) ** 2, axis=(0, 1, 2), keepdims=True)
        return (h - mu) * lax.rsqrt(var + _EPS) * g.reshape(1, 1, 1, -1) \
            + b.reshape(1, 1, 1, -1)

    h = jnp.einsum("nhwc,cd->nhwd", x, p["w1"]) + p["b1"].reshape(1, 1, 1, -1)
    h = jax.nn.relu(bn(h, p["g1"], p["be1"]))
    h = lax.conv_general_dilated(h, p["w2"], (1, 1), "VALID",
                                 dimension_numbers=("NHWC", "HWIO", "NHWC"))
    h = h + p["b2"].reshape(1, 1, 1, -1)
    h = jax.nn.relu(bn(h, p["g2"], p["be2"]))
    h = jnp.einsum("nhwc,cd->nhwd", h, p["w3"]) + p["b3"].reshape(1, 1, 1, -1)
    fx = bn(h, p["g3"], p["be3"])
    if use_conv1d:
        sc = jnp.einsum("nhwc,cd->nhwd", x, p["wd"]) + p["bd"].reshape(1, 1, 1, -1)
    else:
        sc = x
    out = jax.nn.relu(fx + sc)
    return jnp.transpose(out, (0, 3, 1, 2))


def init_params(key, in_channels, out_channels):
    c_in, c_mid, c4 = in_channels, out_channels, 4 * out_channels
    ks = jax.random.split(key, 16)
    n = lambda k, s: (0.1 * jax.random.normal(k, s)).astype(jnp.float32)
    return {
        "w1": n(ks[0], (c_in, c_mid)),  "b1": n(ks[1], (1, c_mid)),
        "g1": 1.0 + n(ks[2], (1, c_mid)), "be1": n(ks[3], (1, c_mid)),
        "w2": n(ks[4], (3, 3, c_mid, c_mid)), "b2": n(ks[5], (1, c_mid)),
        "g2": 1.0 + n(ks[6], (1, c_mid)), "be2": n(ks[7], (1, c_mid)),
        "w3": n(ks[8], (c_mid, c4)),    "b3": n(ks[9], (1, c4)),
        "g3": 1.0 + n(ks[10], (1, c4)), "be3": n(ks[11], (1, c4)),
        "wd": n(ks[12], (c_in, c4)),    "bd": n(ks[13], (1, c4)),
    }


if __name__ == "__main__":
    key = jax.random.PRNGKey(0)
    kx, kp, kx2, kp2 = jax.random.split(key, 4)

    # --- projection-shortcut path (use_conv1D=True) ----------------------------
    # strides=2 on a 6x6 input -> post-stride 3x3 -> the unpadded 3x3 conv output
    # is 1x1 and broadcasts against the shortcut, exactly as PyTorch's forward.
    N, C_IN, C_OUT, H, W, STRIDES = 32, 16, 8, 6, 6, 2
    x = jax.random.normal(kx, (N, C_IN, H, W), dtype=jnp.float32)     # NCHW
    params = init_params(kp, C_IN, C_OUT)

    fwd = jax.jit(functools.partial(deep_residual_block, strides=STRIDES,
                                    use_conv1d=True))
    out = jax.block_until_ready(fwd(x, params))
    ref = reference_forward(x, params, strides=STRIDES, use_conv1d=True)
    assert out.shape == (N, 4 * C_OUT, 3, 3), out.shape
    err = float(jnp.max(jnp.abs(out - ref)))
    # Kernel uses bf16 MXU operands and a bf16 output store; reference is all-f32.
    assert jnp.allclose(out, ref, rtol=5e-2, atol=5e-2), err

    # --- identity-shortcut path (use_conv1D=False: needs C_IN == 4*C_OUT) ------
    N2, C_IN2, C_OUT2 = 16, 32, 8
    x2 = jax.random.normal(kx2, (N2, C_IN2, 3, 3), dtype=jnp.float32)
    params2 = init_params(kp2, C_IN2, C_OUT2)
    fwd2 = jax.jit(functools.partial(deep_residual_block, strides=1,
                                     use_conv1d=False))
    out2 = jax.block_until_ready(fwd2(x2, params2))
    ref2 = reference_forward(x2, params2, strides=1, use_conv1d=False)
    err2 = float(jnp.max(jnp.abs(out2 - ref2)))
    assert jnp.allclose(out2, ref2, rtol=5e-2, atol=5e-2), err2

    print("KERNEL_OK")
</pallas_src>

<mosaic_0001>
module attributes {stable_mosaic.version = 11 : i64} {
  func.func @kernel(%arg0: i32, %arg1: memref<288x128xbf16, #tpu.memory_space<vmem>>, %arg2: memref<128x128xbf16, #tpu.memory_space<vmem>>, %arg3: memref<9x128x128xbf16, #tpu.memory_space<vmem>>, %arg4: memref<128x128xbf16, #tpu.memory_space<vmem>>, %arg5: memref<1x128xf32, #tpu.memory_space<vmem>>, %arg6: memref<1x128xf32, #tpu.memory_space<vmem>>, %arg7: memref<1x128xf32, #tpu.memory_space<vmem>>, %arg8: memref<1x128xf32, #tpu.memory_space<vmem>>, %arg9: memref<1x128xf32, #tpu.memory_space<vmem>>, %arg10: memref<1x128xf32, #tpu.memory_space<vmem>>, %arg11: memref<128x128xbf16, #tpu.memory_space<vmem>>, %arg12: memref<1x128xf32, #tpu.memory_space<vmem>>, %arg13: memref<288x128xbf16, #tpu.memory_space<vmem>>, %arg14: memref<288x128xbf16, #tpu.memory_space<vmem>>, %arg15: memref<288x128xf32, #tpu.memory_space<vmem>>) attributes {dimension_semantics = [#tpu.dimension_semantics<arbitrary>], iteration_bounds = array<i64: 1>, scalar_prefetch = 0 : i64, scratch_operands = 2 : i64, tpu.core_type = #tpu.core_type<tc>, window_params = [{pipeline_mode = #tpu.pipeline_mode<synchronous>, transform_indices = @transform_0, window_bounds = array<i64: 288, 128>}, {pipeline_mode = #tpu.pipeline_mode<synchronous>, transform_indices = @transform_1, window_bounds = array<i64: 128, 128>}, {pipeline_mode = #tpu.pipeline_mode<synchronous>, transform_indices = @transform_2, window_bounds = array<i64: 9, 128, 128>}, {pipeline_mode = #tpu.pipeline_mode<synchronous>, transform_indices = @transform_3, window_bounds = array<i64: 128, 128>}, {pipeline_mode = #tpu.pipeline_mode<synchronous>, transform_indices = @transform_4, window_bounds = array<i64: 1, 128>}, {pipeline_mode = #tpu.pipeline_mode<synchronous>, transform_indices = @transform_5, window_bounds = array<i64: 1, 128>}, {pipeline_mode = #tpu.pipeline_mode<synchronous>, transform_indices = @transform_6, window_bounds = array<i64: 1, 128>}, {pipeline_mode = #tpu.pipeline_mode<synchronous>, transform_indices = @transform_7, window_bounds = array<i64: 1, 128>}, {pipeline_mode = #tpu.pipeline_mode<synchronous>, transform_indices = @transform_8, window_bounds = array<i64: 1, 128>}, {pipeline_mode = #tpu.pipeline_mode<synchronous>, transform_indices = @transform_9, window_bounds = array<i64: 1, 128>}, {pipeline_mode = #tpu.pipeline_mode<synchronous>, transform_indices = @transform_10, window_bounds = array<i64: 128, 128>}, {pipeline_mode = #tpu.pipeline_mode<synchronous>, transform_indices = @transform_11, window_bounds = array<i64: 1, 128>}, {pipeline_mode = #tpu.pipeline_mode<synchronous>, transform_indices = @transform_12, window_bounds = array<i64: 288, 128>}]} {
    %c0 = arith.constant 0 : index
    %c0_0 = arith.constant 0 : index
    %0 = vector.load %arg1[%c0, %c0_0] : memref<288x128xbf16, #tpu.memory_space<vmem>>, vector<288x128xbf16>
    %c0_1 = arith.constant 0 : index
    %c0_2 = arith.constant 0 : index
    %1 = vector.load %arg2[%c0_1, %c0_2] : memref<128x128xbf16, #tpu.memory_space<vmem>>, vector<128x128xbf16>
    %cst = arith.constant dense<0.000000e+00> : vector<288x128xf32>
    %2 = tpu.matmul %0, %1, %cst {dimension_numbers = #tpu.dot_dimension_numbers<[1], [0], [0], [1], [0, 0, 1, 1], [], []>} : vector<288x128xbf16>, vector<128x128xbf16>, vector<288x128xf32> -> vector<288x128xf32>
    %c0_3 = arith.constant 0 : index
    %c0_4 = arith.constant 0 : index
    %3 = vector.load %arg11[%c0_3, %c0_4] : memref<128x128xbf16, #tpu.memory_space<vmem>>, vector<128x128xbf16>
    %cst_5 = arith.constant dense<0.000000e+00> : vector<288x128xf32>
    %4 = tpu.matmul %0, %3, %cst_5 {dimension_numbers = #tpu.dot_dimension_numbers<[1], [0], [0], [1], [0, 0, 1, 1], [], []>} : vector<288x128xbf16>, vector<128x128xbf16>, vector<288x128xf32> -> vector<288x128xf32>
    %c0_6 = arith.constant 0 : index
    %c0_7 = arith.constant 0 : index
    %5 = vector.load %arg12[%c0_6, %c0_7] : memref<1x128xf32, #tpu.memory_space<vmem>>, vector<1x128xf32>
    %6 = vector.broadcast %5 : vector<1x128xf32> to vector<288x128xf32>
    %7 = arith.addf %4, %6 : vector<288x128xf32>
    %c0_8 = arith.constant 0 : index
    %c0_9 = arith.constant 0 : index
    %8 = vector.load %arg15[%c0_8, %c0_9] : memref<288x128xf32, #tpu.memory_space<vmem>>, vector<288x128xf32>
    tpu.vector_store %arg15[%c0_8, %c0_9], %7 {strides = array<i32>} : memref<288x128xf32, #tpu.memory_space<vmem>>, vector<288x128xf32>,
    %cst_10 = arith.constant dense<0.000000e+00> : vector<128xf32>
    %9 = vector.multi_reduction <add>, %2, %cst_10 [0] : vector<288x128xf32> to vector<128xf32>
    %10 = vector.shape_cast %9 : vector<128xf32> to vector<1x128xf32>
    %cst_11 = arith.constant 0.00347222225 : f32
    %11 = vector.broadcast %cst_11 : f32 to vector<1x128xf32>
    %12 = arith.mulf %10, %11 : vector<1x128xf32>
    %13 = vector.broadcast %12 : vector<1x128xf32> to vector<288x128xf32>
    %14 = arith.subf %2, %13 : vector<288x128xf32>
    %15 = arith.mulf %14, %14 : vector<288x128xf32>
    %cst_12 = arith.constant dense<0.000000e+00> : vector<128xf32>
    %16 = vector.multi_reduction <add>, %15, %cst_12 [0] : vector<288x128xf32> to vector<128xf32>
    %17 = vector.shape_cast %16 : vector<128xf32> to vector<1x128xf32>
    %cst_13 = arith.constant 0.00347222225 : f32
    %18 = vector.broadcast %cst_13 : f32 to vector<1x128xf32>
    %19 = arith.mulf %17, %18 : vector<1x128xf32>
    %c0_14 = arith.constant 0 : index
    %c0_15 = arith.constant 0 : index
    %20 = vector.load %arg5[%c0_14, %c0_15] : memref<1x128xf32, #tpu.memory_space<vmem>>, vector<1x128xf32>
    %cst_16 = arith.constant 9.99999974E-6 : f32
    %21 = vector.broadcast %cst_16 : f32 to vector<1x128xf32>
    %22 = arith.addf %19, %21 : vector<1x128xf32>
    %23 = math.rsqrt %22 : vector<1x128xf32>
    %24 = arith.mulf %20, %23 : vector<1x128xf32>
    %25 = vector.broadcast %24 : vector<1x128xf32> to vector<288x128xf32>
    %26 = arith.mulf %14, %25 : vector<288x128xf32>
    %c0_17 = arith.constant 0 : index
    %c0_18 = arith.constant 0 : index
    %27 = vector.load %arg6[%c0_17, %c0_18] : memref<1x128xf32, #tpu.memory_space<vmem>>, vector<1x128xf32>
    %28 = vector.broadcast %27 : vector<1x128xf32> to vector<288x128xf32>
    %29 = arith.addf %26, %28 : vector<288x128xf32>
    %cst_19 = arith.constant 0.000000e+00 : f32
    %30 = vector.broadcast %cst_19 : f32 to vector<288x128xf32>
    %31 = arith.maximumf %29, %30 : vector<288x128xf32>
    %32 = arith.truncf %31 : vector<288x128xf32> to vector<288x128xbf16>
    %c0_20 = arith.constant 0 : index
    %c0_21 = arith.constant 0 : index
    %33 = vector.load %arg14[%c0_20, %c0_21] : memref<288x128xbf16, #tpu.memory_space<vmem>>, vector<288x128xbf16>
    tpu.vector_store %arg14[%c0_20, %c0_21], %32 {strides = array<i32>} : memref<288x128xbf16, #tpu.memory_space<vmem>>, vector<288x128xbf16>,
    %c0_22 = arith.constant 0 : index
    %c0_23 = arith.constant 0 : index
    %34 = vector.load %arg14[%c0_22, %c0_23] : memref<288x128xbf16, #tpu.memory_space<vmem>>, vector<32x128xbf16>
    %c0_24 = arith.constant 0 : index
    %c0_25 = arith.constant 0 : index
    %c0_26 = arith.constant 0 : index
    %35 = vector.load %arg3[%c0_24, %c0_25, %c0_26] : memref<9x128x128xbf16, #tpu.memory_space<vmem>>, vector<1x128x128xbf16>
    %36 = vector.shape_cast %35 : vector<1x128x128xbf16> to vector<128x128xbf16>
    %cst_27 = arith.constant dense<0.000000e+00> : vector<32x128xf32>
    %37 = tpu.matmul %34, %36, %cst_27 {dimension_numbers = #tpu.dot_dimension_numbers<[1], [0], [0], [1], [0, 0, 1, 1], [], []>} : vector<32x128xbf16>, vector<128x128xbf16>, vector<32x128xf32> -> vector<32x128xf32>
    %c32 = arith.constant 32 : index
    %c0_28 = arith.constant 0 : index
    %38 = vector.load %arg14[%c32, %c0_28] : memref<288x128xbf16, #tpu.memory_space<vmem>>, vector<32x128xbf16>
    %c1 = arith.constant 1 : index
    %c0_29 = arith.constant 0 : index
    %c0_30 = arith.constant 0 : index
    %39 = vector.load %arg3[%c1, %c0_29, %c0_30] : memref<9x128x128xbf16, #tpu.memory_space<vmem>>, vector<1x128x128xbf16>
    %40 = vector.shape_cast %39 : vector<1x128x128xbf16> to vector<128x128xbf16>
    %cst_31 = arith.constant dense<0.000000e+00> : vector<32x128xf32>
    %41 = tpu.matmul %38, %40, %cst_31 {dimension_numbers = #tpu.dot_dimension_numbers<[1], [0], [0], [1], [0, 0, 1, 1], [], []>} : vector<32x128xbf16>, vector<128x128xbf16>, vector<32x128xf32> -> vector<32x128xf32>
    %42 = arith.addf %37, %41 : vector<32x128xf32>
    %c64 = arith.constant 64 : index
    %c0_32 = arith.constant 0 : index
    %43 = vector.load %arg14[%c64, %c0_32] : memref<288x128xbf16, #tpu.memory_space<vmem>>, vector<32x128xbf16>
    %c2 = arith.constant 2 : index
    %c0_33 = arith.constant 0 : index
    %c0_34 = arith.constant 0 : index
    %44 = vector.load %arg3[%c2, %c0_33, %c0_34] : memref<9x128x128xbf16, #tpu.memory_space<vmem>>, vector<1x128x128xbf16>
    %45 = vector.shape_cast %44 : vector<1x128x128xbf16> to vector<128x128xbf16>
    %cst_35 = arith.constant dense<0.000000e+00> : vector<32x128xf32>
    %46 = tpu.matmul %43, %45, %cst_35 {dimension_numbers = #tpu.dot_dimension_numbers<[1], [0], [0], [1], [0, 0, 1, 1], [], []>} : vector<32x128xbf16>, vector<128x128xbf16>, vector<32x128xf32> -> vector<32x128xf32>
    %47 = arith.addf %42, %46 : vector<32x128xf32>
    %c96 = arith.constant 96 : index
    %c0_36 = arith.constant 0 : index
    %48 = vector.load %arg14[%c96, %c0_36] : memref<288x128xbf16, #tpu.memory_space<vmem>>, vector<32x128xbf16>
    %c3 = arith.constant 3 : index
    %c0_37 = arith.constant 0 : index
    %c0_38 = arith.constant 0 : index
    %49 = vector.load %arg3[%c3, %c0_37, %c0_38] : memref<9x128x128xbf16, #tpu.memory_space<vmem>>, vector<1x128x128xbf16>
    %50 = vector.shape_cast %49 : vector<1x128x128xbf16> to vector<128x128xbf16>
    %cst_39 = arith.constant dense<0.000000e+00> : vector<32x128xf32>
    %51 = tpu.matmul %48, %50, %cst_39 {dimension_numbers = #tpu.dot_dimension_numbers<[1], [0], [0], [1], [0, 0, 1, 1], [], []>} : vector<32x128xbf16>, vector<128x128xbf16>, vector<32x128xf32> -> vector<32x128xf32>
    %52 = arith.addf %47, %51 : vector<32x128xf32>
    %c128 = arith.constant 128 : index
    %c0_40 = arith.constant 0 : index
    %53 = vector.load %arg14[%c128, %c0_40] : memref<288x128xbf16, #tpu.memory_space<vmem>>, vector<32x128xbf16>
    %c4 = arith.constant 4 : index
    %c0_41 = arith.constant 0 : index
    %c0_42 = arith.constant 0 : index
    %54 = vector.load %arg3[%c4, %c0_41, %c0_42] : memref<9x128x128xbf16, #tpu.memory_space<vmem>>, vector<1x128x128xbf16>
    %55 = vector.shape_cast %54 : vector<1x128x128xbf16> to vector<128x128xbf16>
    %cst_43 = arith.constant dense<0.000000e+00> : vector<32x128xf32>
    %56 = tpu.matmul %53, %55, %cst_43 {dimension_numbers = #tpu.dot_dimension_numbers<[1], [0], [0], [1], [0, 0, 1, 1], [], []>} : vector<32x128xbf16>, vector<128x128xbf16>, vector<32x128xf32> -> vector<32x128xf32>
    %57 = arith.addf %52, %56 : vector<32x128xf32>
    %c160 = arith.constant 160 : index
    %c0_44 = arith.constant 0 : index
    %58 = vector.load %arg14[%c160, %c0_44] : memref<288x128xbf16, #tpu.memory_space<vmem>>, vector<32x128xbf16>
    %c5 = arith.constant 5 : index
    %c0_45 = arith.constant 0 : index
    %c0_46 = arith.constant 0 : index
    %59 = vector.load %arg3[%c5, %c0_45, %c0_46] : memref<9x128x128xbf16, #tpu.memory_space<vmem>>, vector<1x128x128xbf16>
    %60 = vector.shape_cast %59 : vector<1x128x128xbf16> to vector<128x128xbf16>
    %cst_47 = arith.constant dense<0.000000e+00> : vector<32x128xf32>
    %61 = tpu.matmul %58, %60, %cst_47 {dimension_numbers = #tpu.dot_dimension_numbers<[1], [0], [0], [1], [0, 0, 1, 1], [], []>} : vector<32x128xbf16>, vector<128x128xbf16>, vector<32x128xf32> -> vector<32x128xf32>
    %62 = arith.addf %57, %61 : vector<32x128xf32>
    %c192 = arith.constant 192 : index
    %c0_48 = arith.constant 0 : index
    %63 = vector.load %arg14[%c192, %c0_48] : memref<288x128xbf16, #tpu.memory_space<vmem>>, vector<32x128xbf16>
    %c6 = arith.constant 6 : index
    %c0_49 = arith.constant 0 : index
    %c0_50 = arith.constant 0 : index
    %64 = vector.load %arg3[%c6, %c0_49, %c0_50] : memref<9x128x128xbf16, #tpu.memory_space<vmem>>, vector<1x128x128xbf16>
    %65 = vector.shape_cast %64 : vector<1x128x128xbf16> to vector<128x128xbf16>
    %cst_51 = arith.constant dense<0.000000e+00> : vector<32x128xf32>
    %66 = tpu.matmul %63, %65, %cst_51 {dimension_numbers = #tpu.dot_dimension_numbers<[1], [0], [0], [1], [0, 0, 1, 1], [], []>} : vector<32x128xbf16>, vector<128x128xbf16>, vector<32x128xf32> -> vector<32x128xf32>
    %67 = arith.addf %62, %66 : vector<32x128xf32>
    %c224 = arith.constant 224 : index
    %c0_52 = arith.constant 0 : index
    %68 = vector.load %arg14[%c224, %c0_52] : memref<288x128xbf16, #tpu.memory_space<vmem>>, vector<32x128xbf16>
    %c7 = arith.constant 7 : index
    %c0_53 = arith.constant 0 : index
    %c0_54 = arith.constant 0 : index
    %69 = vector.load %arg3[%c7, %c0_53, %c0_54] : memref<9x128x128xbf16, #tpu.memory_space<vmem>>, vector<1x128x128xbf16>
    %70 = vector.shape_cast %69 : vector<1x128x128xbf16> to vector<128x128xbf16>
    %cst_55 = arith.constant dense<0.000000e+00> : vector<32x128xf32>
    %71 = tpu.matmul %68, %70, %cst_55 {dimension_numbers = #tpu.dot_dimension_numbers<[1], [0], [0], [1], [0, 0, 1, 1], [], []>} : vector<32x128xbf16>, vector<128x128xbf16>, vector<32x128xf32> -> vector<32x128xf32>
    %72 = arith.addf %67, %71 : vector<32x128xf32>
    %c256 = arith.constant 256 : index
    %c0_56 = arith.constant 0 : index
    %73 = vector.load %arg14[%c256, %c0_56] : memref<288x128xbf16, #tpu.memory_space<vmem>>, vector<32x128xbf16>
    %c8 = arith.constant 8 : index
    %c0_57 = arith.constant 0 : index
    %c0_58 = arith.constant 0 : index
    %74 = vector.load %arg3[%c8, %c0_57, %c0_58] : memref<9x128x128xbf16, #tpu.memory_space<vmem>>, vector<1x128x128xbf16>
    %75 = vector.shape_cast %74 : vector<1x128x128xbf16> to vector<128x128xbf16>
    %cst_59 = arith.constant dense<0.000000e+00> : vector<32x128xf32>
    %76 = tpu.matmul %73, %75, %cst_59 {dimension_numbers = #tpu.dot_dimension_numbers<[1], [0], [0], [1], [0, 0, 1, 1], [], []>} : vector<32x128xbf16>, vector<128x128xbf16>, vector<32x128xf32> -> vector<32x128xf32>
    %77 = arith.addf %72, %76 : vector<32x128xf32>
    %cst_60 = arith.constant dense<0.000000e+00> : vector<128xf32>
    %78 = vector.multi_reduction <add>, %77, %cst_60 [0] : vector<32x128xf32> to vector<128xf32>
    %79 = vector.shape_cast %78 : vector<128xf32> to vector<1x128xf32>
    %cst_61 = arith.constant 3.125000e-02 : f32
    %80 = vector.broadcast %cst_61 : f32 to vector<1x128xf32>
    %81 = arith.mulf %79, %80 : vector<1x128xf32>
    %82 = vector.broadcast %81 : vector<1x128xf32> to vector<32x128xf32>
    %83 = arith.subf %77, %82 : vector<32x128xf32>
    %84 = arith.mulf %83, %83 : vector<32x128xf32>
    %cst_62 = arith.constant dense<0.000000e+00> : vector<128xf32>
    %85 = vector.multi_reduction <add>, %84, %cst_62 [0] : vector<32x128xf32> to vector<128xf32>
    %86 = vector.shape_cast %85 : vector<128xf32> to vector<1x128xf32>
    %cst_63 = arith.constant 3.125000e-02 : f32
    %87 = vector.broadcast %cst_63 : f32 to vector<1x128xf32>
    %88 = arith.mulf %86, %87 : vector<1x128xf32>
    %c0_64 = arith.constant 0 : index
    %c0_65 = arith.constant 0 : index
    %89 = vector.load %arg7[%c0_64, %c0_65] : memref<1x128xf32, #tpu.memory_space<vmem>>, vector<1x128xf32>
    %cst_66 = arith.constant 9.99999974E-6 : f32
    %90 = vector.broadcast %cst_66 : f32 to vector<1x128xf32>
    %91 = arith.addf %88, %90 : vector<1x128xf32>
    %92 = math.rsqrt %91 : vector<1x128xf32>
    %93 = arith.mulf %89, %92 : vector<1x128xf32>
    %94 = vector.broadcast %93 : vector<1x128xf32> to vector<32x128xf32>
    %95 = arith.mulf %83, %94 : vector<32x128xf32>
    %c0_67 = arith.constant 0 : index
    %c0_68 = arith.constant 0 : index
    %96 = vector.load %arg8[%c0_67, %c0_68] : memref<1x128xf32, #tpu.memory_space<vmem>>, vector<1x128xf32>
    %97 = vector.broadcast %96 : vector<1x128xf32> to vector<32x128xf32>
    %98 = arith.addf %95, %97 : vector<32x128xf32>
    %cst_69 = arith.constant 0.000000e+00 : f32
    %99 = vector.broadcast %cst_69 : f32 to vector<32x128xf32>
    %100 = arith.maximumf %98, %99 : vector<32x128xf32>
    %101 = arith.truncf %100 : vector<32x128xf32> to vector<32x128xbf16>
    %c0_70 = arith.constant 0 : index
    %c0_71 = arith.constant 0 : index
    %102 = vector.load %arg4[%c0_70, %c0_71] : memref<128x128xbf16, #tpu.memory_space<vmem>>, vector<128x128xbf16>
    %cst_72 = arith.constant dense<0.000000e+00> : vector<32x128xf32>
    %103 = tpu.matmul %101, %102, %cst_72 {dimension_numbers = #tpu.dot_dimension_numbers<[1], [0], [0], [1], [0, 0, 1, 1], [], []>} : vector<32x128xbf16>, vector<128x128xbf16>, vector<32x128xf32> -> vector<32x128xf32>
    %cst_73 = arith.constant dense<0.000000e+00> : vector<128xf32>
    %104 = vector.multi_reduction <add>, %103, %cst_73 [0] : vector<32x128xf32> to vector<128xf32>
    %105 = vector.shape_cast %104 : vector<128xf32> to vector<1x128xf32>
    %cst_74 = arith.constant 3.125000e-02 : f32
    %106 = vector.broadcast %cst_74 : f32 to vector<1x128xf32>
    %107 = arith.mulf %105, %106 : vector<1x128xf32>
    %108 = vector.broadcast %107 : vector<1x128xf32> to vector<32x128xf32>
    %109 = arith.subf %103, %108 : vector<32x128xf32>
    %110 = arith.mulf %109, %109 : vector<32x128xf32>
    %cst_75 = arith.constant dense<0.000000e+00> : vector<128xf32>
    %111 = vector.multi_reduction <add>, %110, %cst_75 [0] : vector<32x128xf32> to vector<128xf32>
    %112 = vector.shape_cast %111 : vector<128xf32> to vector<1x128xf32>
    %cst_76 = arith.constant 3.125000e-02 : f32
    %113 = vector.broadcast %cst_76 : f32 to vector<1x128xf32>
    %114 = arith.mulf %112, %113 : vector<1x128xf32>
    %c0_77 = arith.constant 0 : index
    %c0_78 = arith.constant 0 : index
    %115 = vector.load %arg9[%c0_77, %c0_78] : memref<1x128xf32, #tpu.memory_space<vmem>>, vector<1x128xf32>
    %cst_79 = arith.constant 9.99999974E-6 : f32
    %116 = vector.broadcast %cst_79 : f32 to vector<1x128xf32>
    %117 = arith.addf %114, %116 : vector<1x128xf32>
    %118 = math.rsqrt %117 : vector<1x128xf32>
    %119 = arith.mulf %115, %118 : vector<1x128xf32>
    %120 = vector.broadcast %119 : vector<1x128xf32> to vector<32x128xf32>
    %121 = arith.mulf %109, %120 : vector<32x128xf32>
    %c0_80 = arith.constant 0 : index
    %c0_81 = arith.constant 0 : index
    %122 = vector.load %arg10[%c0_80, %c0_81] : memref<1x128xf32, #tpu.memory_space<vmem>>, vector<1x128xf32>
    %123 = vector.broadcast %122 : vector<1x128xf32> to vector<32x128xf32>
    %124 = arith.addf %121, %123 : vector<32x128xf32>
    %c0_82 = arith.constant 0 : index
    %c0_83 = arith.constant 0 : index
    %125 = vector.load %arg15[%c0_82, %c0_83] : memref<288x128xf32, #tpu.memory_space<vmem>>, vector<32x128xf32>
    %126 = arith.addf %124, %125 : vector<32x128xf32>
    %cst_84 = arith.constant 0.000000e+00 : f32
    %127 = vector.broadcast %cst_84 : f32 to vector<32x128xf32>
    %128 = arith.maximumf %126, %127 : vector<32x128xf32>
    %129 = arith.truncf %128 : vector<32x128xf32> to vector<32x128xbf16>
    %c0_85 = arith.constant 0 : index
    %c0_86 = arith.constant 0 : index
    %130 = vector.load %arg13[%c0_85, %c0_86] : memref<288x128xbf16, #tpu.memory_space<vmem>>, vector<32x128xbf16>
    tpu.vector_store %arg13[%c0_85, %c0_86], %129 {strides = array<i32>} : memref<288x128xbf16, #tpu.memory_space<vmem>>, vector<32x128xbf16>,
    %c32_87 = arith.constant 32 : index
    %c0_88 = arith.constant 0 : index
    %131 = vector.load %arg15[%c32_87, %c0_88] : memref<288x128xf32, #tpu.memory_space<vmem>>, vector<32x128xf32>
    %132 = arith.addf %124, %131 : vector<32x128xf32>
    %cst_89 = arith.constant 0.000000e+00 : f32
    %133 = vector.broadcast %cst_89 : f32 to vector<32x128xf32>
    %134 = arith.maximumf %132, %133 : vector<32x128xf32>
    %135 = arith.truncf %134 : vector<32x128xf32> to vector<32x128xbf16>
    %c32_90 = arith.constant 32 : index
    %c0_91 = arith.constant 0 : index
    %136 = vector.load %arg13[%c32_90, %c0_91] : memref<288x128xbf16, #tpu.memory_space<vmem>>, vector<32x128xbf16>
    tpu.vector_store %arg13[%c32_90, %c0_91], %135 {strides = array<i32>} : memref<288x128xbf16, #tpu.memory_space<vmem>>, vector<32x128xbf16>,
    %c64_92 = arith.constant 64 : index
    %c0_93 = arith.constant 0 : index
    %137 = vector.load %arg15[%c64_92, %c0_93] : memref<288x128xf32, #tpu.memory_space<vmem>>, vector<32x128xf32>
    %138 = arith.addf %124, %137 : vector<32x128xf32>
    %cst_94 = arith.constant 0.000000e+00 : f32
    %139 = vector.broadcast %cst_94 : f32 to vector<32x128xf32>
    %140 = arith.maximumf %138, %139 : vector<32x128xf32>
    %141 = arith.truncf %140 : vector<32x128xf32> to vector<32x128xbf16>
    %c64_95 = arith.constant 64 : index
    %c0_96 = arith.constant 0 : index
    %142 = vector.load %arg13[%c64_95, %c0_96] : memref<288x128xbf16, #tpu.memory_space<vmem>>, vector<32x128xbf16>
    tpu.vector_store %arg13[%c64_95, %c0_96], %141 {strides = array<i32>} : memref<288x128xbf16, #tpu.memory_space<vmem>>, vector<32x128xbf16>,
    %c96_97 = arith.constant 96 : index
    %c0_98 = arith.constant 0 : index
    %143 = vector.load %arg15[%c96_97, %c0_98] : memref<288x128xf32, #tpu.memory_space<vmem>>, vector<32x128xf32>
    %144 = arith.addf %124, %143 : vector<32x128xf32>
    %cst_99 = arith.constant 0.000000e+00 : f32
    %145 = vector.broadcast %cst_99 : f32 to vector<32x128xf32>
    %146 = arith.maximumf %144, %145 : vector<32x128xf32>
    %147 = arith.truncf %146 : vector<32x128xf32> to vector<32x128xbf16>
    %c96_100 = arith.constant 96 : index
    %c0_101 = arith.constant 0 : index
    %148 = vector.load %arg13[%c96_100, %c0_101] : memref<288x128xbf16, #tpu.memory_space<vmem>>, vector<32x128xbf16>
    tpu.vector_store %arg13[%c96_100, %c0_101], %147 {strides = array<i32>} : memref<288x128xbf16, #tpu.memory_space<vmem>>, vector<32x128xbf16>,
    %c128_102 = arith.constant 128 : index
    %c0_103 = arith.constant 0 : index
    %149 = vector.load %arg15[%c128_102, %c0_103] : memref<288x128xf32, #tpu.memory_space<vmem>>, vector<32x128xf32>
    %150 = arith.addf %124, %149 : vector<32x128xf32>
    %cst_104 = arith.constant 0.000000e+00 : f32
    %151 = vector.broadcast %cst_104 : f32 to vector<32x128xf32>
    %152 = arith.maximumf %150, %151 : vector<32x128xf32>
    %153 = arith.truncf %152 : vector<32x128xf32> to vector<32x128xbf16>
    %c128_105 = arith.constant 128 : index
    %c0_106 = arith.constant 0 : index
    %154 = vector.load %arg13[%c128_105, %c0_106] : memref<288x128xbf16, #tpu.memory_space<vmem>>, vector<32x128xbf16>
    tpu.vector_store %arg13[%c128_105, %c0_106], %153 {strides = array<i32>} : memref<288x128xbf16, #tpu.memory_space<vmem>>, vector<32x128xbf16>,
    %c160_107 = arith.constant 160 : index
    %c0_108 = arith.constant 0 : index
    %155 = vector.load %arg15[%c160_107, %c0_108] : memref<288x128xf32, #tpu.memory_space<vmem>>, vector<32x128xf32>
    %156 = arith.addf %124, %155 : vector<32x128xf32>
    %cst_109 = arith.constant 0.000000e+00 : f32
    %157 = vector.broadcast %cst_109 : f32 to vector<32x128xf32>
    %158 = arith.maximumf %156, %157 : vector<32x128xf32>
    %159 = arith.truncf %158 : vector<32x128xf32> to vector<32x128xbf16>
    %c160_110 = arith.constant 160 : index
    %c0_111 = arith.constant 0 : index
    %160 = vector.load %arg13[%c160_110, %c0_111] : memref<288x128xbf16, #tpu.memory_space<vmem>>, vector<32x128xbf16>
    tpu.vector_store %arg13[%c160_110, %c0_111], %159 {strides = array<i32>} : memref<288x128xbf16, #tpu.memory_space<vmem>>, vector<32x128xbf16>,
    %c192_112 = arith.constant 192 : index
    %c0_113 = arith.constant 0 : index
    %161 = vector.load %arg15[%c192_112, %c0_113] : memref<288x128xf32, #tpu.memory_space<vmem>>, vector<32x128xf32>
    %162 = arith.addf %124, %161 : vector<32x128xf32>
    %cst_114 = arith.constant 0.000000e+00 : f32
    %163 = vector.broadcast %cst_114 : f32 to vector<32x128xf32>
    %164 = arith.maximumf %162, %163 : vector<32x128xf32>
    %165 = arith.truncf %164 : vector<32x128xf32> to vector<32x128xbf16>
    %c192_115 = arith.constant 192 : index
    %c0_116 = arith.constant 0 : index
    %166 = vector.load %arg13[%c192_115, %c0_116] : memref<288x128xbf16, #tpu.memory_space<vmem>>, vector<32x128xbf16>
    tpu.vector_store %arg13[%c192_115, %c0_116], %165 {strides = array<i32>} : memref<288x128xbf16, #tpu.memory_space<vmem>>, vector<32x128xbf16>,
    %c224_117 = arith.constant 224 : index
    %c0_118 = arith.constant 0 : index
    %167 = vector.load %arg15[%c224_117, %c0_118] : memref<288x128xf32, #tpu.memory_space<vmem>>, vector<32x128xf32>
    %168 = arith.addf %124, %167 : vector<32x128xf32>
    %cst_119 = arith.constant 0.000000e+00 : f32
    %169 = vector.broadcast %cst_119 : f32 to vector<32x128xf32>
    %170 = arith.maximumf %168, %169 : vector<32x128xf32>
    %171 = arith.truncf %170 : vector<32x128xf32> to vector<32x128xbf16>
    %c224_120 = arith.constant 224 : index
    %c0_121 = arith.constant 0 : index
    %172 = vector.load %arg13[%c224_120, %c0_121] : memref<288x128xbf16, #tpu.memory_space<vmem>>, vector<32x128xbf16>
    tpu.vector_store %arg13[%c224_120, %c0_121], %171 {strides = array<i32>} : memref<288x128xbf16, #tpu.memory_space<vmem>>, vector<32x128xbf16>,
    %c256_122 = arith.constant 256 : index
    %c0_123 = arith.constant 0 : index
    %173 = vector.load %arg15[%c256_122, %c0_123] : memref<288x128xf32, #tpu.memory_space<vmem>>, vector<32x128xf32>
    %174 = arith.addf %124, %173 : vector<32x128xf32>
    %cst_124 = arith.constant 0.000000e+00 : f32
    %175 = vector.broadcast %cst_124 : f32 to vector<32x128xf32>
    %176 = arith.maximumf %174, %175 : vector<32x128xf32>
    %177 = arith.truncf %176 : vector<32x128xf32> to vector<32x128xbf16>
    %c256_125 = arith.constant 256 : index
    %c0_126 = arith.constant 0 : index
    %178 = vector.load %arg13[%c256_125, %c0_126] : memref<288x128xbf16, #tpu.memory_space<vmem>>, vector<32x128xbf16>
    tpu.vector_store %arg13[%c256_125, %c0_126], %177 {strides = array<i32>} : memref<288x128xbf16, #tpu.memory_space<vmem>>, vector<32x128xbf16>,
    return
  }
  func.func @transform_0(%arg0: i32) -> (i32, i32) {
    %c0_i32 = arith.constant 0 : i32
    %c0_i32_0 = arith.constant 0 : i32
    %c0_i32_1 = arith.constant 0 : i32
    return %c0_i32, %c0_i32_0 : i32, i32
  }
  func.func @transform_1(%arg0: i32) -> (i32, i32) {
    %c0_i32 = arith.constant 0 : i32
    %c0_i32_0 = arith.constant 0 : i32
    %c0_i32_1 = arith.constant 0 : i32
    return %c0_i32, %c0_i32_0 : i32, i32
  }
  func.func @transform_2(%arg0: i32) -> (i32, i32, i32) {
    %c0_i32 = arith.constant 0 : i32
    %c0_i32_0 = arith.constant 0 : i32
    %c0_i32_1 = arith.constant 0 : i32
    %c0_i32_2 = arith.constant 0 : i32
    return %c0_i32, %c0_i32_0, %c0_i32_1 : i32, i32, i32
  }
  func.func @transform_3(%arg0: i32) -> (i32, i32) {
    %c0_i32 = arith.constant 0 : i32
    %c0_i32_0 = arith.constant 0 : i32
    %c0_i32_1 = arith.constant 0 : i32
    return %c0_i32, %c0_i32_0 : i32, i32
  }
  func.func @transform_4(%arg0: i32) -> (i32, i32) {
    %c0_i32 = arith.constant 0 : i32
    %c0_i32_0 = arith.constant 0 : i32
    %c0_i32_1 = arith.constant 0 : i32
    return %c0_i32, %c0_i32_0 : i32, i32
  }
  func.func @transform_5(%arg0: i32) -> (i32, i32) {
    %c0_i32 = arith.constant 0 : i32
    %c0_i32_0 = arith.constant 0 : i32
    %c0_i32_1 = arith.constant 0 : i32
    return %c0_i32, %c0_i32_0 : i32, i32
  }
  func.func @transform_6(%arg0: i32) -> (i32, i32) {
    %c0_i32 = arith.constant 0 : i32
    %c0_i32_0 = arith.constant 0 : i32
    %c0_i32_1 = arith.constant 0 : i32
    return %c0_i32, %c0_i32_0 : i32, i32
  }
  func.func @transform_7(%arg0: i32) -> (i32, i32) {
    %c0_i32 = arith.constant 0 : i32
    %c0_i32_0 = arith.constant 0 : i32
    %c0_i32_1 = arith.constant 0 : i32
    return %c0_i32, %c0_i32_0 : i32, i32
  }
  func.func @transform_8(%arg0: i32) -> (i32, i32) {
    %c0_i32 = arith.constant 0 : i32
    %c0_i32_0 = arith.constant 0 : i32
    %c0_i32_1 = arith.constant 0 : i32
    return %c0_i32, %c0_i32_0 : i32, i32
  }
  func.func @transform_9(%arg0: i32) -> (i32, i32) {
    %c0_i32 = arith.constant 0 : i32
    %c0_i32_0 = arith.constant 0 : i32
    %c0_i32_1 = arith.constant 0 : i32
    return %c0_i32, %c0_i32_0 : i32, i32
  }
  func.func @transform_10(%arg0: i32) -> (i32, i32) {
    %c0_i32 = arith.constant 0 : i32
    %c0_i32_0 = arith.constant 0 : i32
    %c0_i32_1 = arith.constant 0 : i32
    return %c0_i32, %c0_i32_0 : i32, i32
  }
  func.func @transform_11(%arg0: i32) -> (i32, i32) {
    %c0_i32 = arith.constant 0 : i32
    %c0_i32_0 = arith.constant 0 : i32
    %c0_i32_1 = arith.constant 0 : i32
    return %c0_i32, %c0_i32_0 : i32, i32
  }
  func.func @transform_12(%arg0: i32) -> (i32, i32) {
    %c0_i32 = arith.constant 0 : i32
    %c0_i32_0 = arith.constant 0 : i32
    %c0_i32_1 = arith.constant 0 : i32
    return %c0_i32, %c0_i32_0 : i32, i32
  }
}

</mosaic_0001>

<bundles_post_ra>
// kernel: deep_residual_block.1
= control target key start
LH: loop header
LB: loop body
LE: loop exit
PB: predicated region body
PF: predicated region fallthrough
CT: control target
= control target key end

     0   :  { %s5313_s1 = inlined_call_operand.vmem [shape: bf16[128,128], index: 1, kind: input, shape index: {}]   ;;  %s5314_s0 = inlined_call_operand.vmem [shape: bf16[288,128], index: 0, kind: input, shape index: {}]   ;;  %s5315_s10 = inlined_call_operand.vmem [shape: bf16[128,128], index: 10, kind: input, shape index: {}]   ;;  %s5316_s2 = inlined_call_operand.vmem [shape: bf16[9,128,128], index: 2, kind: input, shape index: {}]   ;;  %s5317_s4 = inlined_call_operand.vmem [shape: f32[1,128], index: 4, kind: input, shape index: {}]   ;;  %s5318_s5 = inlined_call_operand.vmem [shape: f32[1,128], index: 5, kind: input, shape index: {}]   ;;  %s5319_s3 = inlined_call_operand.vmem [shape: bf16[128,128], index: 3, kind: input, shape index: {}]   ;;  %s5320_s6 = inlined_call_operand.vmem [shape: f32[1,128], index: 6, kind: input, shape index: {}]   ;;  %s5321_s7 = inlined_call_operand.vmem [shape: f32[1,128], index: 7, kind: input, shape index: {}]   ;;  %s5322_s11 = inlined_call_operand.vmem [shape: f32[1,128], index: 11, kind: input, shape index: {}]   ;;  %s5323_s8 = inlined_call_operand.vmem [shape: f32[1,128], index: 8, kind: input, shape index: {}]   ;;  %s5324_s9 = inlined_call_operand.vmem [shape: f32[1,128], index: 9, kind: input, shape index: {}]   ;;  %s5325_s12 = inlined_call_operand.vmem [shape: bf16[288,128], index: 12, kind: output, shape index: {}]  }
   0x1   :  { %v3964_v0 = vld [vmem:[%s5313_s1 + $0x38] sm:$0xff]   ;;  %v3965_v1 = vld [vmem:[%s5313_s1 + $0x30] sm:$0xff]   ;;  %v3966_v2 = vld [vmem:[%s5313_s1 + $0x28] sm:$0xff]  }
   0x2   :  { %3660 = vmatprep.subr.bf16.mxu0 %v3964_v0  ;;  %v3967_v3 = vld [vmem:[%s5313_s1 + $0x20] sm:$0xff]   ;;  %v3968_v5 = vld [vmem:[%s5313_s1 + $0x18] sm:$0xff]   ;;  %v3969_v6 = vld [vmem:[%s5313_s1 + $0x10] sm:$0xff]  }
   0x3   :  { %3661 = vmatpush3.bf16.msra.mxu0 %v3964_v0  ;;  %v3972_v4 = vld [vmem:[%s5314_s0] sm:$0xff]   ;;  %v3970_v7 = vld [vmem:[%s5313_s1 + $0x8] sm:$0xff]   ;;  %v4202_v10 = vld [vmem:[%s5314_s0 + $0x10] sm:$0xff]  }
   0x4   :  { %3662 = vmatprep.subr.bf16.mxu0 %v3965_v1  ;;  %3676 = vmatprep.mubr.bf16.mxu0 %v3972_v4  ;;  %v3971_v8 = vld [vmem:[%s5313_s1] sm:$0xff]   ;;  %v4197_v9 = vld [vmem:[%s5314_s0 + $0x8] sm:$0xff]   ;;  %v4209_v11 = vld [vmem:[%s5314_s0 + $0x18] sm:$0xff]  }
   0x5   :  { %3728 = vmatprep.mubr.bf16.mxu1 %v3972_v4  ;;  %v4214_v12 = vld [vmem:[%s5314_s0 + $0x20] sm:$0xff]   ;;  %v4221_v13 = vld [vmem:[%s5314_s0 + $0x28] sm:$0xff]   ;;  %v4226_v14 = vld [vmem:[%s5314_s0 + $0x30] sm:$0xff]  }
   0x6   :  { %v4233_v15 = vld [vmem:[%s5314_s0 + $0x38] sm:$0xff]   ;;  %v4238_v16 = vld [vmem:[%s5314_s0 + $0x40] sm:$0xff]   ;;  %v4245_v17 = vld [vmem:[%s5314_s0 + $0x48] sm:$0xff]  }
   0x7   :  { %3663 = vmatpush3.bf16.msra.mxu0 %v3965_v1  ;;  %v4250_v18 = vld [vmem:[%s5314_s0 + $0x50] sm:$0xff]   ;;  %v4257_v19 = vld [vmem:[%s5314_s0 + $0x58] sm:$0xff]   ;;  %v4262_v20 = vld [vmem:[%s5314_s0 + $0x60] sm:$0xff]  }
   0x8   :  { %3664 = vmatprep.subr.bf16.mxu0 %v3966_v2  ;;  %v4269_v21 = vld [vmem:[%s5314_s0 + $0x68] sm:$0xff]   ;;  %v4274_v22 = vld [vmem:[%s5314_s0 + $0x70] sm:$0xff]   ;;  %v4281_v23 = vld [vmem:[%s5314_s0 + $0x78] sm:$0xff]  }
   0x9   :  { %v4286_v24 = vld [vmem:[%s5314_s0 + $0x80] sm:$0xff]   ;;  %v4293_v25 = vld [vmem:[%s5314_s0 + $0x88] sm:$0xff]   ;;  %v3990_v31 = vld [vmem:[%s5315_s10 + $0x38] sm:$0xff]  }
   0xa   :  { %3712 = vmatprep.subr.bf16.mxu1 %v3990_v31  ;;  %v3991_v49 = vld [vmem:[%s5315_s10 + $0x30] sm:$0xff]   ;;  %v3992_v56 = vld [vmem:[%s5315_s10 + $0x28] sm:$0xff]   ;;  %v3993_v61 = vld [vmem:[%s5315_s10 + $0x20] sm:$0xff]  }
   0xb   :  { %3665 = vmatpush3.bf16.msra.mxu0 %v3966_v2  ;;  %3713 = vmatpush3.bf16.msra.mxu1 %v3990_v31  ;;  %v3994_v2 = vld [vmem:[%s5315_s10 + $0x18] sm:$0xff]  }
   0xc   :  { %3666 = vmatprep.subr.bf16.mxu0 %v3967_v3  ;;  %3714 = vmatprep.subr.bf16.mxu1 %v3991_v49 }
   0xf   :  { %3667 = vmatpush3.bf16.msra.mxu0 %v3967_v3  ;;  %3715 = vmatpush3.bf16.msra.mxu1 %v3991_v49 }
  0x10   :  { %3668 = vmatprep.subr.bf16.mxu0 %v3968_v5  ;;  %3716 = vmatprep.subr.bf16.mxu1 %v3992_v56 }
  0x13   :  { %3669 = vmatpush3.bf16.msra.mxu0 %v3968_v5  ;;  %3717 = vmatpush3.bf16.msra.mxu1 %v3992_v56 }
  0x14   :  { %3670 = vmatprep.subr.bf16.mxu0 %v3969_v6  ;;  %3718 = vmatprep.subr.bf16.mxu1 %v3993_v61 }
  0x17   :  { %3671 = vmatpush3.bf16.msra.mxu0 %v3969_v6  ;;  %3719 = vmatpush3.bf16.msra.mxu1 %v3993_v61 }
  0x18   :  { %3672 = vmatprep.subr.bf16.mxu0 %v3970_v7  ;;  %3720 = vmatprep.subr.bf16.mxu1 %v3994_v2 }
  0x1b   :  { %3673 = vmatpush3.bf16.msra.mxu0 %v3970_v7  ;;  %3721 = vmatpush3.bf16.msra.mxu1 %v3994_v2  ;;  %v3995_v7 = vld [vmem:[%s5315_s10 + $0x10] sm:$0xff]  }
  0x1c   :  { %3674 = vmatprep.subr.bf16.mxu0 %v3971_v8  ;;  %3722 = vmatprep.subr.bf16.mxu1 %v3995_v7 }
  0x1f   :  { %3675 = vmatpush3.bf16.msra.mxu0 %v3971_v8  ;;  %3723 = vmatpush3.bf16.msra.mxu1 %v3995_v7 }
  0x22   :  { %3677 = vmatmul.mubr.bf16.vlgmr.msra.gmra.mxu0 %v4197_v9 }
  0x23   :  { %3680 = vmatprep.mubr.bf16.mxu0 %v4202_v10 }
  0x2a   :  { %3681 = vmatmul.mubr.bf16.gmra.mxu0 %v4209_v11 }
  0x2b   :  { %3684 = vmatprep.mubr.bf16.mxu0 %v4214_v12 }
  0x32   :  { %3685 = vmatmul.mubr.bf16.gmra.mxu0 %v4221_v13 }
  0x33   :  { %3688 = vmatprep.mubr.bf16.mxu0 %v4226_v14 }
  0x3a   :  { %3689 = vmatmul.mubr.bf16.gmra.mxu0 %v4233_v15 }
  0x3b   :  { %3692 = vmatprep.mubr.bf16.mxu0 %v4238_v16 }
  0x42   :  { %3693 = vmatmul.mubr.bf16.gmra.mxu0 %v4245_v17 }
  0x43   :  { %3696 = vmatprep.mubr.bf16.mxu0 %v4250_v18 }
  0x4a   :  { %3697 = vmatmul.mubr.bf16.gmra.mxu0 %v4257_v19 }
  0x4b   :  { %3700 = vmatprep.mubr.bf16.mxu0 %v4262_v20 }
  0x52   :  { %3701 = vmatmul.mubr.bf16.gmra.mxu0 %v4269_v21 }
  0x53   :  { %3704 = vmatprep.mubr.bf16.mxu0 %v4274_v22 }
  0x5a   :  { %3705 = vmatmul.mubr.bf16.gmra.mxu0 %v4281_v23 }
  0x5b   :  { %3708 = vmatprep.mubr.bf16.mxu0 %v4286_v24 }
  0x62   :  { %3709 = vmatmul.mubr.bf16.gmra.mxu0 %v4293_v25 }
  0xe2   :  { %v4296_v26 = vpop.f32.mrf.mxu0 }
  0xe4   :  { %v4298_v27 = vpop.f32.mrf.mxu0 }
  0xe6   :  { %v4300_v28 = vpop.f32.mrf.mxu0 }
  0xe8   :  { %v4302_v29 = vpop.f32.mrf.mxu0 }
  0xe9   :  { %v711_v30 = vadd.f32 %v4302_v29, %v4298_v27 }
  0xea   :  { %v4309_v32 = vpop.f32.mrf.mxu0 }
  0xeb   :  { %v712_v33 = vadd.f32 %v4296_v26, %v711_v30 }
  0xec   :  { %v4312_v34 = vpop.f32.mrf.mxu0 }
  0xed   :  { %v713_v35 = vadd.f32 %v4300_v28, %v712_v33 }
  0xee   :  { %v4315_v36 = vpop.f32.mrf.mxu0 }
  0xef   :  { %v714_v37 = vadd.f32 %v713_v35, %v4312_v34  ;;  %v3996_v35 = vld [vmem:[%s5315_s10 + $0x8] sm:$0xff]  }
  0xf0   :  { %v4318_v38 = vpop.f32.mrf.mxu0  ;;  %3724 = vmatprep.subr.bf16.mxu1 %v3996_v35 }
  0xf1   :  { %v715_v39 = vadd.f32 %v714_v37, %v4318_v38  ;;  %3725 = vmatpush3.bf16.msra.mxu1 %v3996_v35 }
  0xf2   :  { %v4321_v40 = vpop.f32.mrf.mxu0 }
  0xf3   :  { %v716_v41 = vadd.f32 %v4309_v32, %v715_v39 }
  0xf4   :  { %v4324_v42 = vpop.f32.mrf.mxu0 }
  0xf5   :  { %v717_v43 = vadd.f32 %v4315_v36, %v716_v41 }
  0xf6   :  { %v4327_v44 = vpop.f32.mrf.mxu0 }
  0xf7   :  { %v718_v45 = vadd.f32 %v717_v43, %v4324_v42 }
  0xf8   :  { %v4330_v46 = vpop.f32.mrf.mxu0 }
  0xf9   :  { %v719_v47 = vadd.f32 %v718_v45, %v4330_v46  ;;  %v3997_v45 = vld [vmem:[%s5315_s10] sm:$0xff]  }
  0xfa   :  { %v4333_v48 = vpop.f32.mrf.mxu0  ;;  %3726 = vmatprep.subr.bf16.mxu1 %v3997_v45 }
  0xfb   :  { %v720_v50 = vadd.f32 %v4321_v40, %v719_v47  ;;  %3727 = vmatpush3.bf16.msra.mxu1 %v3997_v45 }
  0xfc   :  { %v4339_v51 = vpop.f32.mrf.mxu0 }
  0xfd   :  { %v721_v52 = vadd.f32 %v4327_v44, %v720_v50 }
  0xfe   :  { %v4342_v53 = vpop.f32.mrf.mxu0  ;;  %3729 = vmatmul.mubr.bf16.vlgmr.msra.gmra.mxu1 %v4197_v9 }
  0xff   :  { %v722_v54 = vadd.f32 %v721_v52, %v4339_v51  ;;  %3732 = vmatprep.mubr.bf16.mxu1 %v4202_v10 }
 0x100   :  { %v4345_v55 = vpop.f32.mrf.mxu0 }
 0x101   :  { %v723_v57 = vadd.f32 %v722_v54, %v4345_v55 }
 0x102   :  { %v4351_v58 = vpop.f32.mrf.mxu0 }
 0x103   :  { %v724_v59 = vadd.f32 %v4333_v48, %v723_v57 }
 0x104   :  { %v4354_v60 = vpop.f32.mrf.mxu0 }
 0x105   :  { %v725_v62 = vadd.f32 %v4342_v53, %v724_v59 }
 0x106   :  { %v4360_v63 = vpop.f32.mrf.mxu0  ;;  %3733 = vmatmul.mubr.bf16.gmra.mxu1 %v4209_v11 }
 0x107   :  { %v726_v0 = vadd.f32 %v725_v62, %v4354_v60  ;;  %3736 = vmatprep.mubr.bf16.mxu1 %v4214_v12 }
 0x108   :  { %v4363_v1 = vpop.f32.mrf.mxu0 }
 0x109   :  { %v727_v3 = vadd.f32 %v726_v0, %v4363_v1 }
 0x10a   :  { %v4369_v4 = vpop.f32.mrf.mxu0 }
 0x10b   :  { %v728_v5 = vadd.f32 %v4351_v58, %v727_v3 }
 0x10c   :  { %v4372_v6 = vpop.f32.mrf.mxu0 }
 0x10d   :  { %v729_v8 = vadd.f32 %v4360_v63, %v728_v5 }
 0x10e   :  { %v4378_v30 = vpop.f32.mrf.mxu0  ;;  %3737 = vmatmul.mubr.bf16.gmra.mxu1 %v4221_v13  ;;  %v3998_v13 = vld [vmem:[%s5316_s2 + $0x78] sm:$0xff]  }
 0x10f   :  { %v730_v31 = vadd.f32 %v729_v8, %v4372_v6  ;;  %3740 = vmatprep.mubr.bf16.mxu1 %v4226_v14  ;;  %3764 = vmatprep.subr.bf16.mxu0 %v3998_v13  ;;  %v4002_v14 = vld [vmem:[%s5316_s2 + $0x38] sm:$0xff]  }
 0x110   :  { %v4381_v33 = vpop.f32.mrf.mxu0  ;;  %3765 = vmatpush3.bf16.msra.mxu0 %v3998_v13  ;;  %3784 = vmatprep.subr.bf16.mxu1 %v4002_v14 }
 0x111   :  { %v731_v37 = vadd.f32 %v730_v31, %v4381_v33  ;;  %3785 = vmatpush3.bf16.msra.mxu1 %v4002_v14 }
 0x112   :  { %v4387_v39 = vpop.f32.mrf.mxu0 }
 0x113   :  { %v732_v41 = vadd.f32 %v4369_v4, %v731_v37 }
 0x114   :  { %v4390_v43 = vpop.f32.mrf.mxu0 }
 0x115   :  { %v733_v47 = vadd.f32 %v4378_v30, %v732_v41 }
 0x116   :  { %v4396_v49 = vpop.f32.mrf.mxu0  ;;  %3741 = vmatmul.mubr.bf16.gmra.mxu1 %v4233_v15  ;;  %v3999_v15 = vld [vmem:[%s5316_s2 + $0x70] sm:$0xff]  }
 0x117   :  { %v734_v50 = vadd.f32 %v733_v47, %v4390_v43  ;;  %3744 = vmatprep.mubr.bf16.mxu1 %v4238_v16  ;;  %v4004_v16 = vld [vmem:[%s5316_s2 + $0x30] sm:$0xff]   ;;  %3766 = vmatprep.subr.bf16.mxu0 %v3999_v15 }
 0x118   :  { %v4399_v52 = vpop.f32.mrf.mxu0  ;;  %3767 = vmatpush3.bf16.msra.mxu0 %v3999_v15  ;;  %3786 = vmatprep.subr.bf16.mxu1 %v4004_v16  ;;  %v4011_v15 = vld [vmem:[%s5316_s2 + $0x40] sm:$0xff]  }
 0x119   :  { %v735_v54 = vadd.f32 %v734_v50, %v4399_v52  ;;  %3787 = vmatpush3.bf16.msra.mxu1 %v4004_v16 }
 0x11a   :  { %v4402_v56 = vpop.f32.mrf.mxu0 }
 0x11b   :  { %v736_v57 = vadd.f32 %v4387_v39, %v735_v54 }
 0x11c   :  { %v4407_v59 = vpop.f32.mrf.mxu0 }
 0x11d   :  { %v737_v61 = vadd.f32 %v4396_v49, %v736_v57 }
 0x11e   :  { %v4410_v62 = vpop.f32.mrf.mxu0  ;;  %3745 = vmatmul.mubr.bf16.gmra.mxu1 %v4245_v17 }
 0x11f   :  { %v738_v0 = vadd.f32 %v737_v61, %v4407_v59  ;;  %3748 = vmatprep.mubr.bf16.mxu1 %v4250_v18 }
 0x120   :  { %v4413_v2 = vpop.f32.mrf.mxu0 }
 0x121   :  { %v739_v3 = vadd.f32 %v738_v0, %v4413_v2 }
 0x122   :  { %v3710_v5 = vpop.f32.mrf.mxu0 }
 0x123   :  { %v740_v9 = vadd.f32 %v4402_v56, %v739_v3  ;;  %v4000_v3 = vld [vmem:[%s5316_s2 + $0x68] sm:$0xff]  }
 0x124   :  { %v4419_v10 = vpop.f32.mrf.mxu0  ;;  %3768 = vmatprep.subr.bf16.mxu0 %v4000_v3 }
 0x125   :  { %v741_v7 = vadd.f32 %v4410_v62, %v740_v9  ;;  %3769 = vmatpush3.bf16.msra.mxu0 %v4000_v3 }
 0x126   :  { %v3711_v8 = vpop.f32.mrf.mxu0  ;;  %3749 = vmatmul.mubr.bf16.gmra.mxu1 %v4257_v19 }
 0x127   :  { %v742_v31 = vadd.f32 %v741_v7, %v4419_v10  ;;  %v4001_v7 = vld [vmem:[%s5316_s2 + $0x60] sm:$0xff]   ;;  %3752 = vmatprep.mubr.bf16.mxu1 %v4262_v20  ;;  %v4009_v20 = vld [vmem:[%s5316_s2 + $0x18] sm:$0xff]  }
 0x128   :  { %v4423_v35 = vpop.f32.mrf.mxu0  ;;  %3770 = vmatprep.subr.bf16.mxu0 %v4001_v7 }
 0x129   :  { %v743_v37 = vadd.f32 %v742_v31, %v4423_v35  ;;  %3771 = vmatpush3.bf16.msra.mxu0 %v4001_v7 }
 0x12b   :  { %v744_v41 = vadd.f32 %v3710_v5, %v743_v37 }
 0x12d   :  { %v745_v11 = vadd.f32 %v3711_v8, %v744_v41 }
 0x12e   :  { %3753 = vmatmul.mubr.bf16.gmra.mxu1 %v4269_v21 }
 0x12f   :  { %v746_v45 = vrot.slane %v745_v11, 4  ;;  %3756 = vmatprep.mubr.bf16.mxu1 %v4274_v22  ;;  %v4005_v22 = vld [vmem:[%s5316_s2 + $0x50] sm:$0xff]  }
 0x131   :  { %v747_v47 = vadd.f32 %v746_v45, %v745_v11  ;;  %v4003_v11 = vld [vmem:[%s5316_s2 + $0x58] sm:$0xff]  }
 0x132   :  { %3772 = vmatprep.subr.bf16.mxu0 %v4003_v11 }
 0x133   :  { %v748_v12 = vrot.slane %v747_v47, 2  ;;  %3773 = vmatpush3.bf16.msra.mxu0 %v4003_v11  ;;  %v4577_v11 = vld [vmem:[%s5316_s2 + $0xf8] sm:$0xff]  }
 0x134   :  { %3774 = vmatprep.subr.bf16.mxu0 %v4005_v22 }
 0x135   :  { %v749_v50 = vadd.f32 %v748_v12, %v747_v47 }
 0x136   :  { %3757 = vmatmul.mubr.bf16.gmra.mxu1 %v4281_v23 }
 0x137   :  { %v750_v54 = vrot.slane %v749_v50, 1  ;;  %3775 = vmatpush3.bf16.msra.mxu0 %v4005_v22  ;;  %3760 = vmatprep.mubr.bf16.mxu1 %v4286_v24 }
 0x139   :  { %v751_v57 = vadd.f32 %v750_v54, %v749_v50 }
 0x13b   :  { %v4432_v61 = vmul.f32 0.0034722222, %v751_v57 }
 0x13d   :  { %v4448_v17 = vsub.f32 %v3710_v5, %v4432_v61  ;;  %v4451_v18 = vsub.f32 %v3711_v8, %v4432_v61  ;;  %v4455_v0 = vsub.f32 %v4298_v27, %v4432_v61  ;;  %v4459_v19 = vsub.f32 %v4302_v29, %v4432_v61  ;;  %v4006_v5 = vld [vmem:[%s5316_s2 + $0x28] sm:$0xff]   ;;  %v4007_v8 = vld [vmem:[%s5316_s2 + $0x20] sm:$0xff]  }
 0x13e   :  { %v4469_v27 = vsub.f32 %v4296_v26, %v4432_v61  ;;  %v4484_v26 = vsub.f32 %v4300_v28, %v4432_v61  ;;  %v4488_v31 = vsub.f32 %v4312_v34, %v4432_v61  ;;  %3788 = vmatprep.subr.bf16.mxu1 %v4006_v5  ;;  %v4502_v28 = vsub.f32 %v4318_v38, %v4432_v61  ;;  %v4010_v38 = vld [vmem:[%s5316_s2 + $0x10] sm:$0xff]  }
 0x13f   :  { %v789_v29 = vmul.f32 %v4455_v0, %v4455_v0  ;;  %v790_v9 = vmul.f32 %v4459_v19, %v4459_v19  ;;  %3789 = vmatpush3.bf16.msra.mxu1 %v4006_v5  ;;  %v4508_v21 = vsub.f32 %v4309_v32, %v4432_v61  ;;  %v4520_v50 = vsub.f32 %v4315_v36, %v4432_v61  ;;  %v4008_v36 = vld [vmem:[%s5316_s2 + $0x48] sm:$0xff]  }
 0x140   :  { %v791_v37 = vmul.f32 %v4469_v27, %v4469_v27  ;;  %v792_v34 = vmul.f32 %v4484_v26, %v4484_v26  ;;  %3790 = vmatprep.subr.bf16.mxu1 %v4007_v8  ;;  %v793_v47 = vmul.f32 %v4488_v31, %v4488_v31  ;;  %v794_v32 = vmul.f32 %v4502_v28, %v4502_v28 }
 0x141   :  { %v825_v41 = vadd.f32 %v790_v9, %v789_v29  ;;  %v4526_v57 = vsub.f32 %v4324_v42, %v4432_v61  ;;  %v795_v13 = vmul.f32 %v4508_v21, %v4508_v21  ;;  %v4012_v42 = vld [vmem:[%s5316_s2 + $0x8] sm:$0xff]   ;;  %v4543_v16 = vsub.f32 %v4330_v46, %v4432_v61  ;;  %3776 = vmatprep.subr.bf16.mxu0 %v4008_v36  ;;  %v4013_v46 = vld [vmem:[%s5316_s2] sm:$0xff]  }
 0x142   :  { %v796_v3 = vmul.f32 %v4520_v50, %v4520_v50  ;;  %3777 = vmatpush3.bf16.msra.mxu0 %v4008_v36  ;;  %v4549_v23 = vsub.f32 %v4321_v40, %v4432_v61  ;;  %v4558_v9 = vsub.f32 %v4327_v44, %v4432_v61  ;;  %v4565_v40 = vld [vmem:[%s5316_s2 + $0xb8] sm:$0xff]   ;;  %3761 = vmatmul.mubr.bf16.gmra.mxu1 %v4293_v25 }
 0x143   :  { %v826_v45 = vadd.f32 %v825_v41, %v791_v37  ;;  %3791 = vmatpush3.bf16.msra.mxu1 %v4007_v8  ;;  %v797_v24 = vmul.f32 %v4526_v57, %v4526_v57  ;;  %3778 = vmatprep.subr.bf16.mxu0 %v4011_v15  ;;  %v798_v7 = vmul.f32 %v4543_v16, %v4543_v16 }
 0x144   :  { %3792 = vmatprep.subr.bf16.mxu1 %v4009_v20  ;;  %v4569_v37 = vsub.f32 %v4339_v51, %v4432_v61  ;;  %v799_v41 = vmul.f32 %v4549_v23, %v4549_v23  ;;  %v800_v51 = vmul.f32 %v4558_v9, %v4558_v9  ;;  %v4588_v25 = vsub.f32 %v4333_v48, %v4432_v61 }
 0x145   :  { %v827_v12 = vadd.f32 %v826_v45, %v792_v34 }
 0x146   :  { %3779 = vmatpush3.bf16.msra.mxu0 %v4011_v15  ;;  %v801_v45 = vmul.f32 %v4569_v37, %v4569_v37  ;;  %v803_v48 = vmul.f32 %v4588_v25, %v4588_v25  ;;  %v4619_v15 = vsub.f32 %v4360_v63, %v4432_v61 }
 0x147   :  { %v828_v54 = vadd.f32 %v827_v12, %v793_v47  ;;  %3793 = vmatpush3.bf16.msra.mxu1 %v4009_v20  ;;  %3804 = vmatprep.subr.bf16.mxu0 %v4565_v40  ;;  %v4582_v20 = vsub.f32 %v4345_v55, %v4432_v61  ;;  %v4594_v12 = vsub.f32 %v4342_v53, %v4432_v61 }
 0x148   :  { %3794 = vmatprep.subr.bf16.mxu1 %v4010_v38  ;;  %v808_v63 = vmul.f32 %v4619_v15, %v4619_v15 }
 0x149   :  { %v829_v14 = vadd.f32 %v828_v54, %v794_v32  ;;  %v802_v55 = vmul.f32 %v4582_v20, %v4582_v20  ;;  %v4607_v54 = vsub.f32 %v4363_v1, %v4432_v61  ;;  %v804_v53 = vmul.f32 %v4594_v12, %v4594_v12 }
 0x14b   :  { %v830_v5 = vadd.f32 %v829_v14, %v795_v13  ;;  %3795 = vmatpush3.bf16.msra.mxu1 %v4010_v38  ;;  %v4601_v38 = vsub.f32 %v4354_v60, %v4432_v61  ;;  %v4613_v14 = vsub.f32 %v4351_v58, %v4432_v61  ;;  %v806_v1 = vmul.f32 %v4607_v54, %v4607_v54 }
 0x14c   :  { %3796 = vmatprep.subr.bf16.mxu1 %v4012_v42 }
 0x14d   :  { %v831_v29 = vadd.f32 %v830_v5, %v796_v3  ;;  %v805_v60 = vmul.f32 %v4601_v38, %v4601_v38  ;;  %v4625_v3 = vsub.f32 %v4372_v6, %v4432_v61  ;;  %v807_v58 = vmul.f32 %v4613_v14, %v4613_v14 }
 0x14f   :  { %v832_v8 = vadd.f32 %v831_v29, %v797_v24  ;;  %3797 = vmatpush3.bf16.msra.mxu1 %v4012_v42  ;;  %v4631_v24 = vsub.f32 %v4381_v33, %v4432_v61  ;;  %v809_v6 = vmul.f32 %v4625_v3, %v4625_v3 }
 0x150   :  { %3798 = vmatprep.subr.bf16.mxu1 %v4013_v46 }
 0x151   :  { %v833_v44 = vadd.f32 %v832_v8, %v798_v7  ;;  %v4643_v8 = vsub.f32 %v4378_v30, %v4432_v61  ;;  %v810_v33 = vmul.f32 %v4631_v24, %v4631_v24 }
 0x153   :  { %v834_v34 = vadd.f32 %v833_v44, %v799_v41  ;;  %3799 = vmatpush3.bf16.msra.mxu1 %v4013_v46  ;;  %v4637_v46 = vsub.f32 %v4369_v4, %v4432_v61  ;;  %v4649_v44 = vsub.f32 %v4390_v43, %v4432_v61  ;;  %v812_v30 = vmul.f32 %v4643_v8, %v4643_v8 }
 0x154   :  { %3824 = vmatprep.subr.bf16.mxu1 %v4577_v11 }
 0x155   :  { %v835_v47 = vadd.f32 %v834_v34, %v800_v51  ;;  %v811_v4 = vmul.f32 %v4637_v46, %v4637_v46  ;;  %v4655_v34 = vsub.f32 %v4399_v52, %v4432_v61  ;;  %v813_v43 = vmul.f32 %v4649_v44, %v4649_v44 }
 0x157   :  { %v836_v22 = vadd.f32 %v835_v47, %v801_v45  ;;  %v4661_v47 = vsub.f32 %v4387_v39, %v4432_v61  ;;  %v814_v52 = vmul.f32 %v4655_v34, %v4655_v34 }
 0x159   :  { %v837_v32 = vadd.f32 %v836_v22, %v802_v55  ;;  %v4667_v22 = vsub.f32 %v4396_v49, %v4432_v61  ;;  %v815_v39 = vmul.f32 %v4661_v47, %v4661_v47 }
 0x15b   :  { %v838_v13 = vadd.f32 %v837_v32, %v803_v48  ;;  %v4673_v32 = vsub.f32 %v4407_v59, %v4432_v61  ;;  %v816_v49 = vmul.f32 %v4667_v22, %v4667_v22 }
 0x15d   :  { %v839_v36 = vadd.f32 %v838_v13, %v804_v53  ;;  %v4679_v13 = vsub.f32 %v4413_v2, %v4432_v61  ;;  %v817_v59 = vmul.f32 %v4673_v32, %v4673_v32 }
 0x15f   :  { %v840_v42 = vadd.f32 %v839_v36, %v805_v60  ;;  %v4685_v36 = vsub.f32 %v4402_v56, %v4432_v61  ;;  %v818_v2 = vmul.f32 %v4679_v13, %v4679_v13 }
 0x161   :  { %v841_v5 = vadd.f32 %v840_v42, %v806_v1  ;;  %v4691_v42 = vsub.f32 %v4410_v62, %v4432_v61 }
 0x163   :  { %v842_v29 = vadd.f32 %v841_v5, %v807_v58  ;;  %v785_v5 = vsub.f32 %v4419_v10, %v4432_v61  ;;  %v824_v10 = vmul.f32 %v4451_v18, %v4451_v18 }
 0x165   :  { %v843_v7 = vadd.f32 %v842_v29, %v808_v63  ;;  %v819_v63 = vmul.f32 %v4685_v36, %v4685_v36  ;;  %v786_v29 = vsub.f32 %v4423_v35, %v4432_v61  ;;  %v821_v62 = vmul.f32 %v785_v5, %v785_v5 }
 0x167   :  { %v844_v41 = vadd.f32 %v843_v7, %v809_v6  ;;  %v820_v6 = vmul.f32 %v4691_v42, %v4691_v42 }
 0x169   :  { %v845_v51 = vadd.f32 %v844_v41, %v810_v33  ;;  %v822_v41 = vmul.f32 %v786_v29, %v786_v29 }
 0x16b   :  { %v846_v45 = vadd.f32 %v845_v51, %v811_v4  ;;  %v823_v51 = vmul.f32 %v4448_v17, %v4448_v17 }
 0x16d   :  { %v847_v55 = vadd.f32 %v846_v45, %v812_v30 }
 0x16f   :  { %v848_v48 = vadd.f32 %v847_v55, %v813_v43 }
 0x171   :  { %v849_v53 = vadd.f32 %v848_v48, %v814_v52 }
 0x173   :  { %v850_v60 = vadd.f32 %v849_v53, %v815_v39 }
 0x175   :  { %v851_v1 = vadd.f32 %v850_v60, %v816_v49  ;;  %v872_v60 = vlaneseq }
 0x177   :  { %v852_v58 = vadd.f32 %v851_v1, %v817_v59  ;;  %v873_v59 = vshrl.u32 %v872_v60, 7  ;;  %v867_v1 = vld [vmem:[%s5317_s4] sm:$0x1] }
 0x179   :  { %v853_v56 = vadd.f32 %v852_v58, %v818_v2  ;;  %v4710_v2 = vsub.s32 0, %v873_v59 }
 0x17b   :  { %v854_v7 = vadd.f32 %v853_v56, %v819_v63 }
 0x17d   :  { %v855_v33 = vadd.f32 %v854_v7, %v820_v6  ;;  %v4716_v6 = vld [vmem:[%s5318_s5] ss:$0 sm:$0xff] }
 0x17f   :  { %v856_v4 = vadd.f32 %v855_v33, %v821_v62 }
 0x181   :  { %v857_v30 = vadd.f32 %v856_v4, %v822_v41 }
 0x183   :  { %v858_v45 = vadd.f32 %v857_v30, %v823_v51 }
 0x185   :  { %v859_v43 = vadd.f32 %v858_v45, %v824_v10 }
 0x187   :  { %v860_v55 = vrot.slane %v859_v43, 4 }
 0x189   :  { %v861_v52 = vadd.f32 %v860_v55, %v859_v43 }
 0x18b   :  { %v862_v35 = vrot.slane %v861_v52, 2 }
 0x18d   :  { %v863_v61 = vadd.f32 %v862_v35, %v861_v52 }
 0x18f   :  { %v864_v48 = vrot.slane %v863_v61, 1 }
 0x191   :  { %v865_v39 = vadd.f32 %v864_v48, %v863_v61 }
 0x193   :  { %v866_v53 = vmul.f32 0.0034722222, %v865_v39 }
 0x195   :  { %v868_v49 = vadd.f32 1e-05, %v866_v53 }
 0x197   :  { %4096 = vrsqrt.f32 %v868_v49 }
 0x1a4   :  { %v4097_v58 = vpop.eup %4096 }
 0x1a5   :  { %v870_v63 = vmul.f32 %v4097_v58, %v867_v1 }
 0x1a7   :  { %v875_v56 = vrot.slane %v870_v63, %v4710_v2 }
 0x1a9   :  { %v909_v7 = vmul.f32 %v875_v56, %v785_v5  ;;  %v910_v62 = vmul.f32 %v875_v56, %v786_v29  ;;  %v877_v33 = vmul.f32 %v875_v56, %v4455_v0  ;;  %v878_v41 = vmul.f32 %v875_v56, %v4459_v19 }
 0x1aa   :  { %v879_v4 = vmul.f32 %v875_v56, %v4469_v27  ;;  %v880_v51 = vmul.f32 %v875_v56, %v4484_v26  ;;  %v881_v30 = vmul.f32 %v875_v56, %v4488_v31  ;;  %v882_v10 = vmul.f32 %v875_v56, %v4502_v28 }
 0x1ab   :  { %v952_v45 = vadd.f32 %v4716_v6, %v909_v7  ;;  %v953_v43 = vadd.f32 %v4716_v6, %v910_v62  ;;  %v883_v55 = vmul.f32 %v875_v56, %v4508_v21  ;;  %v884_v5 = vmul.f32 %v875_v56, %v4520_v50 }
 0x1ac   :  { %v885_v0 = vmul.f32 %v875_v56, %v4526_v57  ;;  %v886_v19 = vmul.f32 %v875_v56, %v4543_v16  ;;  %v887_v27 = vmul.f32 %v875_v56, %v4549_v23  ;;  %v888_v26 = vmul.f32 %v875_v56, %v4558_v9 }
 0x1ad   :  { %v988_v29 = vmax.f32 %v952_v45, 0.0  ;;  %v989_v31 = vmax.f32 %v953_v43, 0.0  ;;  %v889_v28 = vmul.f32 %v875_v56, %v4569_v37  ;;  %v890_v52 = vmul.f32 %v875_v56, %v4582_v20 }
 0x1ae   :  { %v891_v35 = vmul.f32 %v875_v56, %v4588_v25  ;;  %v892_v21 = vmul.f32 %v875_v56, %v4594_v12  ;;  %v893_v50 = vmul.f32 %v875_v56, %v4601_v38  ;;  %v894_v57 = vmul.f32 %v875_v56, %v4607_v54 }
 0x1af   :  { %v3377_v61 = vpack.c.bf16 %v989_v31, %v988_v29  ;;  %v895_v16 = vmul.f32 %v875_v56, %v4613_v14  ;;  %v896_v23 = vmul.f32 %v875_v56, %v4619_v15  ;;  %v897_v9 = vmul.f32 %v875_v56, %v4625_v3 }
 0x1b0   :  { %v898_v48 = vmul.f32 %v875_v56, %v4631_v24  ;;  %v899_v37 = vmul.f32 %v875_v56, %v4637_v46  ;;  %v900_v20 = vmul.f32 %v875_v56, %v4643_v8  ;;  %v901_v25 = vmul.f32 %v875_v56, %v4649_v44 }
 0x1b1   :  { %3489 = vst [vmem:[#allocation2 + $0x80] sm:$0xff] %v3377_v61   ;;  %v902_v12 = vmul.f32 %v875_v56, %v4655_v34  ;;  %v903_v38 = vmul.f32 %v875_v56, %v4661_v47  ;;  %v904_v54 = vmul.f32 %v875_v56, %v4667_v22  ;;  %v905_v14 = vmul.f32 %v875_v56, %v4673_v32 }
 0x1b2   :  { %v906_v15 = vmul.f32 %v875_v56, %v4679_v13  ;;  %v907_v3 = vmul.f32 %v875_v56, %v4685_v36  ;;  %v908_v24 = vmul.f32 %v875_v56, %v4691_v42  ;;  %v911_v46 = vmul.f32 %v875_v56, %v4448_v17 }
 0x1b3   :  { %v912_v8 = vmul.f32 %v875_v56, %v4451_v18  ;;  %v4755_v44 = vadd.f32 %v4716_v6, %v877_v33  ;;  %v4758_v34 = vadd.f32 %v4716_v6, %v878_v41  ;;  %v4761_v47 = vadd.f32 %v4716_v6, %v879_v4 }
 0x1b4   :  { %v4764_v22 = vadd.f32 %v4716_v6, %v880_v51  ;;  %v4767_v32 = vadd.f32 %v4716_v6, %v881_v30  ;;  %v4770_v13 = vadd.f32 %v4716_v6, %v882_v10  ;;  %v4773_v17 = vadd.f32 %v4716_v6, %v883_v55 }
 0x1b5   :  { %v4776_v18 = vadd.f32 %v4716_v6, %v884_v5  ;;  %v4779_v36 = vadd.f32 %v4716_v6, %v885_v0  ;;  %v4782_v42 = vadd.f32 %v4716_v6, %v886_v19  ;;  %v4785_v39 = vadd.f32 %v4716_v6, %v887_v27 }
 0x1b6   :  { %v4788_v53 = vadd.f32 %v4716_v6, %v888_v26  ;;  %v4791_v49 = vadd.f32 %v4716_v6, %v889_v28  ;;  %v933_v60 = vadd.f32 %v4716_v6, %v890_v52  ;;  %v934_v59 = vadd.f32 %v4716_v6, %v891_v35 }
 0x1b7   :  { %v935_v1 = vadd.f32 %v4716_v6, %v892_v21  ;;  %v936_v58 = vadd.f32 %v4716_v6, %v893_v50  ;;  %v937_v63 = vadd.f32 %v4716_v6, %v894_v57  ;;  %v938_v56 = vadd.f32 %v4716_v6, %v895_v16 }
 0x1b8   :  { %v939_v7 = vadd.f32 %v4716_v6, %v896_v23  ;;  %v940_v62 = vadd.f32 %v4716_v6, %v897_v9  ;;  %v941_v33 = vadd.f32 %v4716_v6, %v898_v48  ;;  %v942_v41 = vadd.f32 %v4716_v6, %v899_v37 }
 0x1b9   :  { %v943_v4 = vadd.f32 %v4716_v6, %v900_v20  ;;  %v944_v51 = vadd.f32 %v4716_v6, %v901_v25  ;;  %v945_v30 = vadd.f32 %v4716_v6, %v902_v12  ;;  %v946_v10 = vadd.f32 %v4716_v6, %v903_v38 }
 0x1ba   :  { %v947_v45 = vadd.f32 %v4716_v6, %v904_v54  ;;  %v948_v43 = vadd.f32 %v4716_v6, %v905_v14  ;;  %v949_v55 = vadd.f32 %v4716_v6, %v906_v15  ;;  %v950_v5 = vadd.f32 %v4716_v6, %v907_v3 }
 0x1bb   :  { %v951_v0 = vadd.f32 %v4716_v6, %v908_v24  ;;  %v954_v19 = vadd.f32 %v4716_v6, %v911_v46  ;;  %v955_v27 = vadd.f32 %v4716_v6, %v912_v8  ;;  %v956_v26 = vmax.f32 %v4755_v44, 0.0 }
 0x1bc   :  { %v957_v29 = vmax.f32 %v4758_v34, 0.0  ;;  %v958_v31 = vmax.f32 %v4761_v47, 0.0  ;;  %v959_v28 = vmax.f32 %v4764_v22, 0.0  ;;  %v960_v52 = vmax.f32 %v4767_v32, 0.0 }
 0x1bd   :  { %v961_v35 = vmax.f32 %v4770_v13, 0.0  ;;  %v962_v21 = vmax.f32 %v4773_v17, 0.0  ;;  %v963_v50 = vmax.f32 %v4776_v18, 0.0  ;;  %v964_v57 = vmax.f32 %v4779_v36, 0.0 }
 0x1be   :  { %v965_v6 = vmax.f32 %v4782_v42, 0.0  ;;  %v966_v61 = vmax.f32 %v4785_v39, 0.0  ;;  %v967_v16 = vmax.f32 %v4788_v53, 0.0  ;;  %v968_v23 = vmax.f32 %v4791_v49, 0.0 }
 0x1bf   :  { %v969_v9 = vmax.f32 %v933_v60, 0.0  ;;  %v970_v48 = vmax.f32 %v934_v59, 0.0  ;;  %v971_v37 = vmax.f32 %v935_v1, 0.0  ;;  %v972_v20 = vmax.f32 %v936_v58, 0.0 }
 0x1c0   :  { %v973_v25 = vmax.f32 %v937_v63, 0.0  ;;  %v974_v12 = vmax.f32 %v938_v56, 0.0  ;;  %v975_v38 = vmax.f32 %v939_v7, 0.0  ;;  %v976_v54 = vmax.f32 %v940_v62, 0.0 }
 0x1c1   :  { %v977_v14 = vmax.f32 %v941_v33, 0.0  ;;  %v978_v15 = vmax.f32 %v942_v41, 0.0  ;;  %v979_v3 = vmax.f32 %v943_v4, 0.0  ;;  %v980_v24 = vmax.f32 %v944_v51, 0.0 }
 0x1c2   :  { %v981_v46 = vmax.f32 %v945_v30, 0.0  ;;  %v982_v8 = vmax.f32 %v946_v10, 0.0  ;;  %v983_v44 = vmax.f32 %v947_v45, 0.0  ;;  %v984_v34 = vmax.f32 %v948_v43, 0.0  ;;  %v4022_v10 = vld [vmem:[%s5316_s2 + $0xb0] sm:$0xff]  }
 0x1c3   :  { %v985_v47 = vmax.f32 %v949_v55, 0.0  ;;  %v986_v22 = vmax.f32 %v950_v5, 0.0  ;;  %v987_v32 = vmax.f32 %v951_v0, 0.0  ;;  %v990_v13 = vmax.f32 %v954_v19, 0.0  ;;  %v4023_v43 = vld [vmem:[%s5316_s2 + $0xf0] sm:$0xff]   ;;  %v4024_v19 = vld [vmem:[%s5316_s2 + $0xa8] sm:$0xff]  }
 0x1c4   :  { %v991_v17 = vmax.f32 %v955_v27, 0.0  ;;  %v3297_v18 = vpack.c.bf16 %v957_v29, %v956_v26  ;;  %v3302_v36 = vpack.c.bf16 %v959_v28, %v958_v31  ;;  %v3307_v42 = vpack.c.bf16 %v961_v35, %v960_v52  ;;  %v4025_v27 = vld [vmem:[%s5316_s2 + $0xe8] sm:$0xff]   ;;  %v4028_v26 = vld [vmem:[%s5316_s2 + $0x98] sm:$0xff]   ;;  %v4030_v31 = vld [vmem:[%s5316_s2 + $0x90] sm:$0xff]  }
 0x1c5   :  { %v3312_v39 = vpack.c.bf16 %v963_v50, %v962_v21  ;;  %v3317_v53 = vpack.c.bf16 %v965_v6, %v964_v57  ;;  %v3322_v49 = vpack.c.bf16 %v967_v16, %v966_v61  ;;  %v3327_v60 = vpack.c.bf16 %v969_v9, %v968_v23  ;;  %v4029_v29 = vld [vmem:[%s5316_s2 + $0xd8] sm:$0xff]   ;;  %v4031_v28 = vld [vmem:[%s5316_s2 + $0xd0] sm:$0xff]   ;;  %v4032_v52 = vld [vmem:[%s5316_s2 + $0x88] sm:$0xff]  }
 0x1c6   :  { %v3332_v59 = vpack.c.bf16 %v971_v37, %v970_v48  ;;  %v3337_v1 = vpack.c.bf16 %v973_v25, %v972_v20  ;;  %v3342_v58 = vpack.c.bf16 %v975_v38, %v974_v12  ;;  %v3347_v63 = vpack.c.bf16 %v977_v14, %v976_v54  ;;  %3298 = vst [vmem:[#allocation2] sm:$0xff] %v3297_v18   ;;  %v4033_v35 = vld [vmem:[%s5316_s2 + $0xc8] sm:$0xff]   ;;  %v4034_v21 = vld [vmem:[%s5316_s2 + $0x80] sm:$0xff]   ;;  %v4038_v57 = vld [vmem:[%s5316_s2 + $0x138] sm:$0xff]  }
 0x1c7   :  { %3474 = vst [vmem:[#allocation2 + $0x8] sm:$0xff] %v3302_v36   ;;  %3475 = vst [vmem:[#allocation2 + $0x10] sm:$0xff] %v3307_v42   ;;  %v3352_v56 = vpack.c.bf16 %v979_v3, %v978_v15  ;;  %v3357_v7 = vpack.c.bf16 %v981_v46, %v980_v24  ;;  %v3362_v62 = vpack.c.bf16 %v983_v44, %v982_v8  ;;  %v4035_v50 = vld [vmem:[%s5316_s2 + $0xc0] sm:$0xff]   ;;  %v4039_v6 = vld [vmem:[%s5316_s2 + $0x178] sm:$0xff]  }
 0x1c8   :  { %v3367_v33 = vpack.c.bf16 %v985_v47, %v984_v34  ;;  %3476 = vst [vmem:[#allocation2 + $0x18] sm:$0xff] %v3312_v39   ;;  %3477 = vst [vmem:[#allocation2 + $0x20] sm:$0xff] %v3317_v53   ;;  %v3372_v41 = vpack.c.bf16 %v987_v32, %v986_v22  ;;  %v3382_v4 = vpack.c.bf16 %v991_v17, %v990_v13  ;;  %v4042_v23 = vld [vmem:[%s5316_s2 + $0x130] sm:$0xff]   ;;  %v4044_v20 = vld [vmem:[%s5316_s2 + $0x128] sm:$0xff]  }
 0x1c9   :  { %3478 = vst [vmem:[#allocation2 + $0x28] sm:$0xff] %v3322_v49   ;;  %3479 = vst [vmem:[#allocation2 + $0x30] sm:$0xff] %v3327_v60   ;;  %v4043_v48 = vld [vmem:[%s5316_s2 + $0x170] sm:$0xff]   ;;  %v4045_v25 = vld [vmem:[%s5316_s2 + $0x168] sm:$0xff]  }
 0x1ca   :  { %3480 = vst [vmem:[#allocation2 + $0x38] sm:$0xff] %v3332_v59   ;;  %3481 = vst [vmem:[#allocation2 + $0x40] sm:$0xff] %v3337_v1   ;;  %v4046_v12 = vld [vmem:[%s5316_s2 + $0x120] sm:$0xff]   ;;  %v4048_v54 = vld [vmem:[%s5316_s2 + $0x118] sm:$0xff]  }
 0x1cb   :  { %3482 = vst [vmem:[#allocation2 + $0x48] sm:$0xff] %v3342_v58   ;;  %3483 = vst [vmem:[#allocation2 + $0x50] sm:$0xff] %v3347_v63   ;;  %v4047_v38 = vld [vmem:[%s5316_s2 + $0x160] sm:$0xff]   ;;  %v4049_v14 = vld [vmem:[%s5316_s2 + $0x158] sm:$0xff]  }
 0x1cc   :  { %3484 = vst [vmem:[#allocation2 + $0x58] sm:$0xff] %v3352_v56   ;;  %3485 = vst [vmem:[#allocation2 + $0x60] sm:$0xff] %v3357_v7   ;;  %v4050_v15 = vld [vmem:[%s5316_s2 + $0x110] sm:$0xff]   ;;  %v4052_v24 = vld [vmem:[%s5316_s2 + $0x108] sm:$0xff]  }
 0x1cd   :  { %3486 = vst [vmem:[#allocation2 + $0x68] sm:$0xff] %v3362_v62   ;;  %3487 = vst [vmem:[#allocation2 + $0x70] sm:$0xff] %v3367_v33   ;;  %v4015_v30 = vld [vmem:[#allocation2] sm:$0xff]   ;;  %v4051_v3 = vld [vmem:[%s5316_s2 + $0x150] sm:$0xff]  }
 0x1ce   :  { %3488 = vst [vmem:[#allocation2 + $0x78] sm:$0xff] %v3372_v41   ;;  %3490 = vst [vmem:[#allocation2 + $0x88] sm:$0xff] %v3382_v4   ;;  %v4014_v51 = vld [vmem:[#allocation2 + $0x10] sm:$0xff]   ;;  %3800 = vmatprep.mubr.bf16.mxu1 %v4015_v30  ;;  %v4019_v55 = vld [vmem:[#allocation2 + $0x8] sm:$0xff]  }
 0x1cf   :  { %3780 = vmatprep.mubr.bf16.mxu0 %v4014_v51  ;;  %v4018_v45 = vld [vmem:[#allocation2 + $0x18] sm:$0xff]   ;;  %v4020_v5 = vld [vmem:[#allocation2 + $0x20] sm:$0xff]   ;;  %3801 = vmatmul.mubr.bf16.vlgmr.msra.gmra.mxu1 %v4019_v55  ;;  %v4053_v46 = vld [vmem:[%s5316_s2 + $0x148] sm:$0xff]  }
 0x1d0   :  { %3781 = vmatmul.mubr.bf16.vlgmr.msra.gmra.mxu0 %v4018_v45  ;;  %v4021_v0 = vld [vmem:[#allocation2 + $0x30] sm:$0xff]   ;;  %3825 = vmatpush3.bf16.msra.mxu1 %v4577_v11  ;;  %v4027_v11 = vld [vmem:[%s5316_s2 + $0xe0] sm:$0xff]   ;;  %v4036_v61 = vld [vmem:[#allocation2 + $0x28] sm:$0xff]  }
 0x1d1   :  { %3805 = vmatpush3.bf16.msra.mxu0 %v4565_v40  ;;  %3820 = vmatprep.mubr.bf16.mxu0 %v4020_v5  ;;  %v4026_v40 = vld [vmem:[%s5316_s2 + $0xa0] sm:$0xff]   ;;  %v4037_v16 = vld [vmem:[#allocation2 + $0x38] sm:$0xff]   ;;  %v4062_v13 = vld [vmem:[%s5316_s2 + $0x1b0] sm:$0xff]  }
 0x1d2   :  { %3840 = vmatprep.mubr.bf16.mxu1 %v4021_v0  ;;  %3806 = vmatprep.subr.bf16.mxu0 %v4022_v10  ;;  %v4040_v9 = vld [vmem:[#allocation2 + $0x40] sm:$0xff]   ;;  %v4041_v37 = vld [vmem:[#allocation2 + $0x50] sm:$0xff]   ;;  %v4058_v34 = vld [vmem:[%s5316_s2 + $0x1b8] sm:$0xff]  }
 0x1d3   :  { %3826 = vmatprep.subr.bf16.mxu1 %v4023_v43  ;;  %v4054_v8 = vld [vmem:[%s5316_s2 + $0x100] sm:$0xff]   ;;  %v4059_v47 = vld [vmem:[%s5316_s2 + $0x1f8] sm:$0xff]   ;;  %v4056_v22 = vld [vmem:[#allocation2 + $0x48] sm:$0xff]  }
 0x1d4   :  { %3827 = vmatpush3.bf16.msra.mxu1 %v4023_v43  ;;  %v4055_v44 = vld [vmem:[%s5316_s2 + $0x140] sm:$0xff]   ;;  %v4057_v32 = vld [vmem:[#allocation2 + $0x58] sm:$0xff]   ;;  %v4063_v18 = vld [vmem:[%s5316_s2 + $0x1f0] sm:$0xff]  }
 0x1d5   :  { %3807 = vmatpush3.bf16.msra.mxu0 %v4022_v10  ;;  %3828 = vmatprep.subr.bf16.mxu1 %v4025_v27  ;;  %v4060_v17 = vld [vmem:[#allocation2 + $0x60] sm:$0xff]   ;;  %v4061_v36 = vld [vmem:[#allocation2 + $0x70] sm:$0xff]   ;;  %v4064_v42 = vld [vmem:[%s5316_s2 + $0x1a8] sm:$0xff]  }
 0x1d6   :  { %3808 = vmatprep.subr.bf16.mxu0 %v4024_v19  ;;  %v4065_v39 = vld [vmem:[%s5316_s2 + $0x1e8] sm:$0xff]   ;;  %v4066_v53 = vld [vmem:[%s5316_s2 + $0x1a0] sm:$0xff]   ;;  %v4068_v60 = vld [vmem:[%s5316_s2 + $0x198] sm:$0xff]  }
 0x1d7   :  { %v4067_v49 = vld [vmem:[%s5316_s2 + $0x1e0] sm:$0xff]   ;;  %v4069_v59 = vld [vmem:[%s5316_s2 + $0x1d8] sm:$0xff]   ;;  %v4070_v1 = vld [vmem:[%s5316_s2 + $0x190] sm:$0xff]  }
 0x1d8   :  { %3829 = vmatpush3.bf16.msra.mxu1 %v4025_v27  ;;  %v4071_v58 = vld [vmem:[%s5316_s2 + $0x1d0] sm:$0xff]   ;;  %v4072_v63 = vld [vmem:[%s5316_s2 + $0x188] sm:$0xff]   ;;  %v4074_v7 = vld [vmem:[%s5316_s2 + $0x180] sm:$0xff]  }
 0x1d9   :  { %3809 = vmatpush3.bf16.msra.mxu0 %v4024_v19  ;;  %3830 = vmatprep.subr.bf16.mxu1 %v4027_v11  ;;  %v4073_v56 = vld [vmem:[%s5316_s2 + $0x1c8] sm:$0xff]   ;;  %v4075_v62 = vld [vmem:[%s5316_s2 + $0x1c0] sm:$0xff]   ;;  %v4078_v33 = vld [vmem:[%s5316_s2 + $0x238] sm:$0xff]   ;;  %v4991_v19 = vpop.f32.mrf.mxu1 }
 0x1da   :  { %3810 = vmatprep.subr.bf16.mxu0 %v4026_v40  ;;  %v4076_v41 = vld [vmem:[#allocation2 + $0x68] sm:$0xff]   ;;  %v4080_v4 = vld [vmem:[%s5316_s2 + $0x230] sm:$0xff]   ;;  %v4077_v51 = vld [vmem:[#allocation2 + $0x78] sm:$0xff]  }
 0x1db   :  { %v4079_v30 = vld [vmem:[#allocation2 + $0x80] sm:$0xff]   ;;  %v4081_v10 = vld [vmem:[%s5316_s2 + $0x228] sm:$0xff]   ;;  %v4083_v43 = vld [vmem:[%s5316_s2 + $0x218] sm:$0xff]  }
 0x1dc   :  { %3831 = vmatpush3.bf16.msra.mxu1 %v4027_v11  ;;  %v4082_v45 = vld [vmem:[%s5316_s2 + $0x220] sm:$0xff]   ;;  %v4084_v55 = vld [vmem:[%s5316_s2 + $0x210] sm:$0xff]   ;;  %v4085_v5 = vld [vmem:[%s5316_s2 + $0x208] sm:$0xff]  }
 0x1dd   :  { %3811 = vmatpush3.bf16.msra.mxu0 %v4026_v40  ;;  %3832 = vmatprep.subr.bf16.mxu1 %v4029_v29  ;;  %v4086_v0 = vld [vmem:[%s5316_s2 + $0x200] sm:$0xff]   ;;  %v4087_v27 = vld [vmem:[#allocation2 + $0x88] sm:$0xff]   ;;  %v4993_v40 = vpop.f32.mrf.mxu1 }
 0x1de   :  { %3812 = vmatprep.subr.bf16.mxu0 %v4028_v26 }
 0x1df   :  { %v4995_v11 = vpop.f32.mrf.mxu1 }
 0x1e0   :  { %3833 = vmatpush3.bf16.msra.mxu1 %v4029_v29 }
 0x1e1   :  { %3813 = vmatpush3.bf16.msra.mxu0 %v4028_v26  ;;  %3834 = vmatprep.subr.bf16.mxu1 %v4031_v28  ;;  %v4997_v26 = vpop.f32.mrf.mxu1 }
 0x1e2   :  { %3814 = vmatprep.subr.bf16.mxu0 %v4030_v31 }
 0x1e3   :  { %v4999_v29 = vpop.f32.mrf.mxu1 }
 0x1e4   :  { %3835 = vmatpush3.bf16.msra.mxu1 %v4031_v28 }
 0x1e5   :  { %3815 = vmatpush3.bf16.msra.mxu0 %v4030_v31  ;;  %3836 = vmatprep.subr.bf16.mxu1 %v4033_v35  ;;  %v5001_v31 = vpop.f32.mrf.mxu1 }
 0x1e6   :  { %3816 = vmatprep.subr.bf16.mxu0 %v4032_v52 }
 0x1e7   :  { %v5003_v28 = vpop.f32.mrf.mxu1 }
 0x1e8   :  { %3837 = vmatpush3.bf16.msra.mxu1 %v4033_v35 }
 0x1e9   :  { %3817 = vmatpush3.bf16.msra.mxu0 %v4032_v52  ;;  %3838 = vmatprep.subr.bf16.mxu1 %v4035_v50  ;;  %v5005_v52 = vpop.f32.mrf.mxu1 }
 0x1ea   :  { %3818 = vmatprep.subr.bf16.mxu0 %v4034_v21 }
 0x1eb   :  { %v5007_v35 = vpop.f32.mrf.mxu1 }
 0x1ec   :  { %3839 = vmatpush3.bf16.msra.mxu1 %v4035_v50 }
 0x1ed   :  { %3819 = vmatpush3.bf16.msra.mxu0 %v4034_v21  ;;  %3864 = vmatprep.subr.bf16.mxu1 %v4039_v6  ;;  %v5009_v21 = vpop.f32.mrf.mxu1 }
 0x1ee   :  { %3844 = vmatprep.subr.bf16.mxu0 %v4038_v57 }
 0x1ef   :  { %3841 = vmatmul.mubr.bf16.vlgmr.msra.gmra.mxu1 %v4037_v16  ;;  %v5011_v50 = vpop.f32.mrf.mxu1 }
 0x1f0   :  { %3821 = vmatmul.mubr.bf16.vlgmr.msra.gmra.mxu0 %v4036_v61  ;;  %3865 = vmatpush3.bf16.msra.mxu1 %v4039_v6 }
 0x1f1   :  { %3845 = vmatpush3.bf16.msra.mxu0 %v4038_v57  ;;  %3860 = vmatprep.mubr.bf16.mxu0 %v4040_v9  ;;  %v5013_v57 = vpop.f32.mrf.mxu1 }
 0x1f2   :  { %3880 = vmatprep.mubr.bf16.mxu1 %v4041_v37  ;;  %3846 = vmatprep.subr.bf16.mxu0 %v4042_v23 }
 0x1f3   :  { %3866 = vmatprep.subr.bf16.mxu1 %v4043_v48  ;;  %v5015_v6 = vpop.f32.mrf.mxu1 }
 0x1f4   :  { %3867 = vmatpush3.bf16.msra.mxu1 %v4043_v48 }
 0x1f5   :  { %3847 = vmatpush3.bf16.msra.mxu0 %v4042_v23  ;;  %3868 = vmatprep.subr.bf16.mxu1 %v4045_v25  ;;  %v5017_v61 = vpop.f32.mrf.mxu1 }
 0x1f6   :  { %3848 = vmatprep.subr.bf16.mxu0 %v4044_v20 }
 0x1f7   :  { %v5019_v16 = vpop.f32.mrf.mxu1 }
 0x1f8   :  { %3869 = vmatpush3.bf16.msra.mxu1 %v4045_v25 }
 0x1f9   :  { %3849 = vmatpush3.bf16.msra.mxu0 %v4044_v20  ;;  %3870 = vmatprep.subr.bf16.mxu1 %v4047_v38  ;;  %v5021_v23 = vpop.f32.mrf.mxu1 }
 0x1fa   :  { %3850 = vmatprep.subr.bf16.mxu0 %v4046_v12 }
 0x1fb   :  { %v5023_v9 = vpop.f32.mrf.mxu1 }
 0x1fc   :  { %3871 = vmatpush3.bf16.msra.mxu1 %v4047_v38 }
 0x1fd   :  { %3851 = vmatpush3.bf16.msra.mxu0 %v4046_v12  ;;  %3872 = vmatprep.subr.bf16.mxu1 %v4049_v14  ;;  %v5025_v48 = vpop.f32.mrf.mxu1 }
 0x1fe   :  { %3852 = vmatprep.subr.bf16.mxu0 %v4048_v54 }
 0x1ff   :  { %v5027_v37 = vpop.f32.mrf.mxu1 }
 0x200   :  { %3873 = vmatpush3.bf16.msra.mxu1 %v4049_v14 }
 0x201   :  { %3853 = vmatpush3.bf16.msra.mxu0 %v4048_v54  ;;  %3874 = vmatprep.subr.bf16.mxu1 %v4051_v3  ;;  %v5029_v20 = vpop.f32.mrf.mxu1 }
 0x202   :  { %3854 = vmatprep.subr.bf16.mxu0 %v4050_v15  ;;  %5326 = vst [vmem:[#allocation4_spill] sm:$0xff] %v5029_v20 }
 0x203   :  { %v5031_v25 = vpop.f32.mrf.mxu1 }
 0x204   :  { %3875 = vmatpush3.bf16.msra.mxu1 %v4051_v3  ;;  %5327 = vst [vmem:[#allocation5_spill] sm:$0xff] %v5031_v25 }
 0x205   :  { %3855 = vmatpush3.bf16.msra.mxu0 %v4050_v15  ;;  %3876 = vmatprep.subr.bf16.mxu1 %v4053_v46  ;;  %v5033_v12 = vpop.f32.mrf.mxu1 }
 0x206   :  { %3856 = vmatprep.subr.bf16.mxu0 %v4052_v24  ;;  %5328 = vst [vmem:[#allocation6_spill] sm:$0xff] %v5033_v12 }
 0x207   :  { %v5035_v38 = vpop.f32.mrf.mxu1 }
 0x208   :  { %3877 = vmatpush3.bf16.msra.mxu1 %v4053_v46  ;;  %5329 = vst [vmem:[#allocation7_spill] sm:$0xff] %v5035_v38 }
 0x209   :  { %3857 = vmatpush3.bf16.msra.mxu0 %v4052_v24  ;;  %3878 = vmatprep.subr.bf16.mxu1 %v4055_v44  ;;  %v5037_v54 = vpop.f32.mrf.mxu1 }
 0x20a   :  { %3858 = vmatprep.subr.bf16.mxu0 %v4054_v8  ;;  %5330 = vst [vmem:[#allocation8_spill] sm:$0xff] %v5037_v54 }
 0x20b   :  { %v5039_v14 = vpop.f32.mrf.mxu1 }
 0x20c   :  { %3879 = vmatpush3.bf16.msra.mxu1 %v4055_v44  ;;  %5331 = vst [vmem:[#allocation9_spill] sm:$0xff] %v5039_v14 }
 0x20d   :  { %3859 = vmatpush3.bf16.msra.mxu0 %v4054_v8  ;;  %3904 = vmatprep.subr.bf16.mxu1 %v4059_v47  ;;  %v5041_v15 = vpop.f32.mrf.mxu1 }
 0x20e   :  { %3884 = vmatprep.subr.bf16.mxu0 %v4058_v34  ;;  %5332 = vst [vmem:[#allocation10_spill] sm:$0xff] %v5041_v15 }
 0x20f   :  { %3881 = vmatmul.mubr.bf16.vlgmr.msra.gmra.mxu1 %v4057_v32  ;;  %v5043_v3 = vpop.f32.mrf.mxu1 }
 0x210   :  { %3861 = vmatmul.mubr.bf16.vlgmr.msra.gmra.mxu0 %v4056_v22  ;;  %3905 = vmatpush3.bf16.msra.mxu1 %v4059_v47  ;;  %5333 = vst [vmem:[#allocation11_spill] sm:$0xff] %v5043_v3  ;;  %v4088_v22 = vld [vmem:[%s5319_s3 + $0x38] sm:$0xff]  }
 0x211   :  { %3885 = vmatpush3.bf16.msra.mxu0 %v4058_v34  ;;  %3900 = vmatprep.mubr.bf16.mxu0 %v4060_v17  ;;  %v5045_v24 = vpop.f32.mrf.mxu1 }
 0x212   :  { %3920 = vmatprep.mubr.bf16.mxu1 %v4061_v36  ;;  %3886 = vmatprep.subr.bf16.mxu0 %v4062_v13  ;;  %5334 = vst [vmem:[#allocation12_spill] sm:$0xff] %v5045_v24 }
 0x213   :  { %3906 = vmatprep.subr.bf16.mxu1 %v4063_v18  ;;  %v5047_v46 = vpop.f32.mrf.mxu1 }
 0x214   :  { %3907 = vmatpush3.bf16.msra.mxu1 %v4063_v18  ;;  %5335 = vst [vmem:[#allocation13_spill] sm:$0xff] %v5047_v46  ;;  %v4090_v18 = vld [vmem:[%s5319_s3 + $0x28] sm:$0xff]  }
 0x215   :  { %3887 = vmatpush3.bf16.msra.mxu0 %v4062_v13  ;;  %3908 = vmatprep.subr.bf16.mxu1 %v4065_v39  ;;  %v5049_v8 = vpop.f32.mrf.mxu1  ;;  %v4089_v13 = vld [vmem:[%s5319_s3 + $0x30] sm:$0xff]  }
 0x216   :  { %3888 = vmatprep.subr.bf16.mxu0 %v4064_v42  ;;  %5336 = vst [vmem:[#allocation14_spill] sm:$0xff] %v5049_v8 }
 0x217   :  { %v5051_v44 = vpop.f32.mrf.mxu1 }
 0x218   :  { %3909 = vmatpush3.bf16.msra.mxu1 %v4065_v39  ;;  %5337 = vst [vmem:[#allocation15_spill] sm:$0xff] %v5051_v44 }
 0x219   :  { %3889 = vmatpush3.bf16.msra.mxu0 %v4064_v42  ;;  %3910 = vmatprep.subr.bf16.mxu1 %v4067_v49  ;;  %v5053_v34 = vpop.f32.mrf.mxu1  ;;  %v4091_v42 = vld [vmem:[%s5319_s3 + $0x20] sm:$0xff]  }
 0x21a   :  { %3890 = vmatprep.subr.bf16.mxu0 %v4066_v53  ;;  %5338 = vst [vmem:[#allocation16_spill] sm:$0xff] %v5053_v34 }
 0x21b   :  { %v5055_v47 = vpop.f32.mrf.mxu1 }
 0x21c   :  { %3911 = vmatpush3.bf16.msra.mxu1 %v4067_v49  ;;  %5339 = vst [vmem:[#allocation17_spill] sm:$0xff] %v5055_v47 }
 0x21d   :  { %3891 = vmatpush3.bf16.msra.mxu0 %v4066_v53  ;;  %3912 = vmatprep.subr.bf16.mxu1 %v4069_v59  ;;  %v5060_v32 = vpop.f32.mrf.mxu1  ;;  %v4092_v53 = vld [vmem:[%s5319_s3 + $0x18] sm:$0xff]  }
 0x21e   :  { %3892 = vmatprep.subr.bf16.mxu0 %v4068_v60  ;;  %5340 = vst [vmem:[#allocation18_spill] sm:$0xff] %v5060_v32 }
 0x21f   :  { %v5065_v17 = vpop.f32.mrf.mxu1 }
 0x220   :  { %3913 = vmatpush3.bf16.msra.mxu1 %v4069_v59  ;;  %5341 = vst [vmem:[#allocation19_spill] sm:$0xff] %v5065_v17  ;;  %v4093_v59 = vld [vmem:[%s5319_s3 + $0x10] sm:$0xff]  }
 0x221   :  { %3893 = vmatpush3.bf16.msra.mxu0 %v4068_v60  ;;  %3914 = vmatprep.subr.bf16.mxu1 %v4071_v58  ;;  %v5073_v39 = vpop.f32.mrf.mxu1 }
 0x222   :  { %3894 = vmatprep.subr.bf16.mxu0 %v4070_v1  ;;  %5342 = vst [vmem:[#allocation20_spill] sm:$0xff] %v5073_v39 }
 0x224   :  { %3915 = vmatpush3.bf16.msra.mxu1 %v4071_v58 }
 0x225   :  { %3895 = vmatpush3.bf16.msra.mxu0 %v4070_v1  ;;  %3916 = vmatprep.subr.bf16.mxu1 %v4073_v56 }
 0x226   :  { %3896 = vmatprep.subr.bf16.mxu0 %v4072_v63 }
 0x228   :  { %3917 = vmatpush3.bf16.msra.mxu1 %v4073_v56 }
 0x229   :  { %3897 = vmatpush3.bf16.msra.mxu0 %v4072_v63  ;;  %3918 = vmatprep.subr.bf16.mxu1 %v4075_v62  ;;  %v4094_v63 = vld [vmem:[%s5319_s3 + $0x8] sm:$0xff]  }
 0x22a   :  { %3898 = vmatprep.subr.bf16.mxu0 %v4074_v7 }
 0x22c   :  { %3919 = vmatpush3.bf16.msra.mxu1 %v4075_v62 }
 0x22d   :  { %3899 = vmatpush3.bf16.msra.mxu0 %v4074_v7  ;;  %3944 = vmatprep.subr.bf16.mxu1 %v4088_v22 }
 0x22e   :  { %3924 = vmatprep.subr.bf16.mxu0 %v4078_v33 }
 0x22f   :  { %3921 = vmatmul.mubr.bf16.vlgmr.msra.gmra.mxu1 %v4077_v51 }
 0x230   :  { %3901 = vmatmul.mubr.bf16.vlgmr.msra.gmra.mxu0 %v4076_v41  ;;  %3945 = vmatpush3.bf16.msra.mxu1 %v4088_v22 }
 0x231   :  { %3925 = vmatpush3.bf16.msra.mxu0 %v4078_v33  ;;  %3940 = vmatprep.mubr.bf16.mxu0 %v4079_v30  ;;  %v4095_v33 = vld [vmem:[%s5319_s3] sm:$0xff]  }
 0x232   :  { %3926 = vmatprep.subr.bf16.mxu0 %v4080_v4  ;;  %3946 = vmatprep.subr.bf16.mxu1 %v4089_v13 }
 0x234   :  { %3947 = vmatpush3.bf16.msra.mxu1 %v4089_v13 }
 0x235   :  { %3927 = vmatpush3.bf16.msra.mxu0 %v4080_v4  ;;  %3948 = vmatprep.subr.bf16.mxu1 %v4090_v18 }
 0x236   :  { %3928 = vmatprep.subr.bf16.mxu0 %v4081_v10 }
 0x238   :  { %3949 = vmatpush3.bf16.msra.mxu1 %v4090_v18 }
 0x239   :  { %3929 = vmatpush3.bf16.msra.mxu0 %v4081_v10  ;;  %3950 = vmatprep.subr.bf16.mxu1 %v4091_v42 }
 0x23a   :  { %3930 = vmatprep.subr.bf16.mxu0 %v4082_v45 }
 0x23c   :  { %3951 = vmatpush3.bf16.msra.mxu1 %v4091_v42 }
 0x23d   :  { %3931 = vmatpush3.bf16.msra.mxu0 %v4082_v45  ;;  %3952 = vmatprep.subr.bf16.mxu1 %v4092_v53 }
 0x23e   :  { %3932 = vmatprep.subr.bf16.mxu0 %v4083_v43 }
 0x240   :  { %3953 = vmatpush3.bf16.msra.mxu1 %v4092_v53 }
 0x241   :  { %3933 = vmatpush3.bf16.msra.mxu0 %v4083_v43  ;;  %3954 = vmatprep.subr.bf16.mxu1 %v4093_v59 }
 0x242   :  { %3934 = vmatprep.subr.bf16.mxu0 %v4084_v55 }
 0x244   :  { %3955 = vmatpush3.bf16.msra.mxu1 %v4093_v59 }
 0x245   :  { %3935 = vmatpush3.bf16.msra.mxu0 %v4084_v55  ;;  %3956 = vmatprep.subr.bf16.mxu1 %v4094_v63 }
 0x246   :  { %3936 = vmatprep.subr.bf16.mxu0 %v4085_v5 }
 0x248   :  { %3957 = vmatpush3.bf16.msra.mxu1 %v4094_v63 }
 0x249   :  { %3937 = vmatpush3.bf16.msra.mxu0 %v4085_v5  ;;  %3958 = vmatprep.subr.bf16.mxu1 %v4095_v33 }
 0x24a   :  { %3938 = vmatprep.subr.bf16.mxu0 %v4086_v0 }
 0x24c   :  { %3959 = vmatpush3.bf16.msra.mxu1 %v4095_v33 }
 0x24d   :  { %3939 = vmatpush3.bf16.msra.mxu0 %v4086_v0 }
 0x250   :  { %3941 = vmatmul.mubr.bf16.vlgmr.msra.gmra.mxu0 %v4087_v27 }
 0x28f   :  { %v3802_v60 = vpop.f32.mrf.mxu1 }
 0x290   :  { %v3782_v36 = vpop.f32.mrf.mxu0 }
 0x291   :  { %v1416_v58 = vpop.f32.mrf.mxu1  ;;  %v1425_v39 = vadd.f32 %v3802_v60, %v3782_v36 }
 0x292   :  { %v1307_v49 = vpop.f32.mrf.mxu0 }
 0x293   :  { %v3803_v7 = vpop.f32.mrf.mxu1  ;;  %v1417_v59 = vadd.f32 %v1416_v58, %v1307_v49 }
 0x294   :  { %v3783_v1 = vpop.f32.mrf.mxu0 }
 0x295   :  { %v1419_v41 = vpop.f32.mrf.mxu1  ;;  %v1428_v34 = vadd.f32 %v3803_v7, %v3783_v1 }
 0x296   :  { %v1310_v56 = vpop.f32.mrf.mxu0 }
 0x297   :  { %v1420_v63 = vadd.f32 %v1419_v41, %v1310_v56 }
 0x2af   :  { %v3842_v51 = vpop.f32.mrf.mxu1 }
 0x2b0   :  { %v3822_v62 = vpop.f32.mrf.mxu0 }
 0x2b1   :  { %v1680_v10 = vpop.f32.mrf.mxu1  ;;  %v1563_v44 = vadd.f32 %v3822_v62, %v1425_v39 }
 0x2b2   :  { %v1546_v4 = vpop.f32.mrf.mxu0 }
 0x2b3   :  { %v3843_v43 = vpop.f32.mrf.mxu1  ;;  %v1561_v17 = vadd.f32 %v1546_v4, %v1417_v59  ;;  %v1697_v14 = vadd.f32 %v3842_v51, %v1563_v44 }
 0x2b4   :  { %v3823_v30 = vpop.f32.mrf.mxu0 }
 0x2b5   :  { %v1683_v5 = vpop.f32.mrf.mxu1  ;;  %v1695_v46 = vadd.f32 %v1680_v10, %v1561_v17  ;;  %v1564_v24 = vadd.f32 %v3823_v30, %v1428_v34 }
 0x2b6   :  { %v1549_v45 = vpop.f32.mrf.mxu0 }
 0x2b7   :  { %v1562_v32 = vadd.f32 %v1549_v45, %v1420_v63  ;;  %v1698_v25 = vadd.f32 %v3843_v43, %v1564_v24 }
 0x2b9   :  { %v1696_v3 = vadd.f32 %v1683_v5, %v1562_v32 }
 0x2cf   :  { %v3882_v27 = vpop.f32.mrf.mxu1 }
 0x2d0   :  { %v3862_v55 = vpop.f32.mrf.mxu0 }
 0x2d1   :  { %v1948_v13 = vpop.f32.mrf.mxu1  ;;  %v1831_v20 = vadd.f32 %v3862_v55, %v1697_v14 }
 0x2d2   :  { %v1814_v0 = vpop.f32.mrf.mxu0 }
 0x2d3   :  { %v3883_v42 = vpop.f32.mrf.mxu1  ;;  %v1829_v54 = vadd.f32 %v1814_v0, %v1695_v46  ;;  %v1965_v4 = vadd.f32 %v3882_v27, %v1831_v20 }
 0x2d4   :  { %v3863_v22 = vpop.f32.mrf.mxu0 }
 0x2d5   :  { %v1951_v47 = vpop.f32.mrf.mxu1  ;;  %v1963_v58 = vadd.f32 %v1948_v13, %v1829_v54  ;;  %v1832_v36 = vadd.f32 %v3863_v22, %v1698_v25 }
 0x2d6   :  { %v1817_v18 = vpop.f32.mrf.mxu0 }
 0x2d7   :  { %v1830_v38 = vadd.f32 %v1817_v18, %v1696_v3  ;;  %v1966_v17 = vadd.f32 %v3883_v42, %v1832_v36 }
 0x2d9   :  { %v1964_v60 = vadd.f32 %v1951_v47, %v1830_v38 }
 0x2ef   :  { %v3922_v8 = vpop.f32.mrf.mxu1 }
 0x2f0   :  { %v3902_v53 = vpop.f32.mrf.mxu0 }
 0x2f1   :  { %v2216_v12 = vpop.f32.mrf.mxu1  ;;  %v2099_v34 = vadd.f32 %v3902_v53, %v1965_v4 }
 0x2f2   :  { %v2082_v33 = vpop.f32.mrf.mxu0 }
 0x2f3   :  { %v3923_v56 = vpop.f32.mrf.mxu1  ;;  %v2097_v1 = vadd.f32 %v2082_v33, %v1963_v58  ;;  %v2233_v24 = vadd.f32 %v3922_v8, %v2099_v34 }
 0x2f4   :  { %v3903_v15 = vpop.f32.mrf.mxu0 }
 0x2f5   :  { %v2219_v32 = vpop.f32.mrf.mxu1  ;;  %v2231_v44 = vadd.f32 %v2216_v12, %v2097_v1  ;;  %v2100_v46 = vadd.f32 %v3903_v15, %v1966_v17 }
 0x2f6   :  { %v2085_v49 = vpop.f32.mrf.mxu0 }
 0x2f7   :  { %v2098_v39 = vadd.f32 %v2085_v49, %v1964_v60  ;;  %v2234_v54 = vadd.f32 %v3923_v56, %v2100_v46 }
 0x2f9   :  { %v2232_v3 = vadd.f32 %v2219_v32, %v2098_v39 }
 0x310   :  { %v3942_v41 = vpop.f32.mrf.mxu0 }
 0x311   :  { %v2367_v25 = vadd.f32 %v3942_v41, %v2233_v24 }
 0x312   :  { %v2350_v7 = vpop.f32.mrf.mxu0 }
 0x313   :  { %v2365_v14 = vadd.f32 %v2350_v7, %v2231_v44  ;;  %v2397_v7 = vld [vmem:[%s5320_s6] sm:$0x1] }
 0x314   :  { %v3943_v62 = vpop.f32.mrf.mxu0 }
 0x315   :  { %v2368_v47 = vadd.f32 %v3943_v62, %v2234_v54  ;;  %v3176_v62 = vld [vmem:[%s5321_s7] ss:$0 sm:$0xff] }
 0x316   :  { %v2353_v51 = vpop.f32.mrf.mxu0 }
 0x317   :  { %v2366_v30 = vadd.f32 %v2353_v51, %v2232_v3 }
 0x319   :  { %v2369_v38 = vadd.f32 %v2366_v30, %v2365_v14 }
 0x31b   :  { %v2370_v10 = vadd.f32 %v2369_v38, %v2367_v25 }
 0x31d   :  { %v2371_v20 = vadd.f32 %v2370_v10, %v2368_v47 }
 0x31f   :  { %v2372_v45 = vrot.slane %v2371_v20, 4 }
 0x321   :  { %v2373_v43 = vadd.f32 %v2372_v45, %v2371_v20 }
 0x323   :  { %v2374_v55 = vrot.slane %v2373_v43, 2 }
 0x325   :  { %v2375_v5 = vadd.f32 %v2374_v55, %v2373_v43 }
 0x327   :  { %v2376_v0 = vrot.slane %v2375_v5, 1 }
 0x329   :  { %v2377_v27 = vadd.f32 %v2376_v0, %v2375_v5 }
 0x32b   :  { %v2378_v22 = vmul.f32 0.03125, %v2377_v27 }
 0x32d   :  { %v2379_v12 = vsub.f32 %v2365_v14, %v2378_v22  ;;  %v2380_v15 = vsub.f32 %v2366_v30, %v2378_v22  ;;  %v2381_v13 = vsub.f32 %v2367_v25, %v2378_v22  ;;  %v2382_v18 = vsub.f32 %v2368_v47, %v2378_v22 }
 0x32f   :  { %v2383_v8 = vmul.f32 %v2379_v12, %v2379_v12  ;;  %v2384_v42 = vmul.f32 %v2380_v15, %v2380_v15  ;;  %v2385_v53 = vmul.f32 %v2381_v13, %v2381_v13  ;;  %v2386_v63 = vmul.f32 %v2382_v18, %v2382_v18 }
 0x331   :  { %v2387_v59 = vadd.f32 %v2384_v42, %v2383_v8 }
 0x333   :  { %v2388_v33 = vadd.f32 %v2387_v59, %v2385_v53 }
 0x335   :  { %v2389_v49 = vadd.f32 %v2388_v33, %v2386_v63 }
 0x337   :  { %v2390_v58 = vrot.slane %v2389_v49, 4 }
 0x339   :  { %v2391_v36 = vadd.f32 %v2390_v58, %v2389_v49 }
 0x33b   :  { %v2392_v60 = vrot.slane %v2391_v36, 2 }
 0x33d   :  { %v2393_v56 = vadd.f32 %v2392_v60, %v2391_v36 }
 0x33f   :  { %v2394_v41 = vrot.slane %v2393_v56, 1 }
 0x341   :  { %v2395_v4 = vadd.f32 %v2394_v41, %v2393_v56 }
 0x343   :  { %v2396_v1 = vmul.f32 0.03125, %v2395_v4 }
 0x345   :  { %v2398_v39 = vadd.f32 1e-05, %v2396_v1 }
 0x347   :  { %4098 = vrsqrt.f32 %v2398_v39 }
 0x354   :  { %v4099_v17 = vpop.eup %4098 }
 0x355   :  { %v2400_v34 = vmul.f32 %v4099_v17, %v2397_v7 }
 0x357   :  { %v2405_v32 = vrot.slane %v2400_v34, %v4710_v2 }
 0x359   :  { %v2408_v44 = vmul.f32 %v2405_v32, %v2380_v15  ;;  %v2407_v46 = vmul.f32 %v2405_v32, %v2379_v12  ;;  %v2409_v3 = vmul.f32 %v2405_v32, %v2381_v13  ;;  %v2410_v51 = vmul.f32 %v2405_v32, %v2382_v18 }
 0x35b   :  { %v2418_v24 = vadd.f32 %v3176_v62, %v2407_v46  ;;  %v2419_v14 = vadd.f32 %v3176_v62, %v2408_v44  ;;  %v2420_v30 = vadd.f32 %v3176_v62, %v2409_v3  ;;  %v2421_v54 = vadd.f32 %v3176_v62, %v2410_v51  ;;  %v2912_v51 = vld [vmem:[%s5322_s11] ss:$0 sm:$0xff] }
 0x35d   :  { %v2422_v25 = vmax.f32 %v2418_v24, 0.0  ;;  %v2423_v38 = vmax.f32 %v2419_v14, 0.0  ;;  %v2424_v47 = vmax.f32 %v2420_v30, 0.0  ;;  %v2425_v10 = vmax.f32 %v2421_v54, 0.0 }
 0x35e   :  { %v541_v24 = vadd.f32 %v4991_v19, %v2912_v51  ;;  %v533_v14 = vadd.f32 %v2912_v51, %v4993_v40  ;;  %v544_v30 = vadd.f32 %v4995_v11, %v2912_v51  ;;  %v536_v54 = vadd.f32 %v2912_v51, %v4997_v26 }
 0x35f   :  { %v2426_v20 = vpack.c.bf16 %v2423_v38, %v2422_v25  ;;  %v2427_v45 = vpack.c.bf16 %v2425_v10, %v2424_v47  ;;  %v557_v25 = vadd.f32 %v4999_v29, %v2912_v51  ;;  %v549_v38 = vadd.f32 %v2912_v51, %v5001_v31  ;;  %v2569_v47 = vld [vmem:[%s5323_s8] sm:$0x1] }
 0x360   :  { %v560_v10 = vadd.f32 %v5003_v28, %v2912_v51  ;;  %v5109_v19 = vadd.f32 %v5007_v35, %v2912_v51  ;;  %v565_v40 = vadd.f32 %v2912_v51, %v5009_v21  ;;  %v576_v26 = vadd.f32 %v5011_v50, %v2912_v51 }
 0x361   :  { %3960 = vmatprep.mubr.bf16.mxu1 %v2426_v20  ;;  %v552_v20 = vadd.f32 %v2912_v51, %v5005_v52  ;;  %v568_v29 = vadd.f32 %v2912_v51, %v5013_v57  ;;  %v5115_v31 = vadd.f32 %v5015_v6, %v2912_v51  ;;  %v5121_v28 = vadd.f32 %v5019_v16, %v2912_v51  ;;  %v5343_v6 = vld [vmem:[#allocation4_spill] sm:$0xff]  ;;  %v5345_v16 = vld [vmem:[#allocation6_spill] sm:$0xff] }
 0x362   :  { %3961 = vmatmul.mubr.bf16.vlgmr.msra.gmra.mxu1 %v2427_v45  ;;  %v5118_v45 = vadd.f32 %v2912_v51, %v5017_v61  ;;  %v5124_v52 = vadd.f32 %v2912_v51, %v5021_v23  ;;  %v5127_v35 = vadd.f32 %v5023_v9, %v2912_v51  ;;  %v5130_v50 = vadd.f32 %v2912_v51, %v5025_v48  ;;  %v5344_v61 = vld [vmem:[#allocation5_spill] sm:$0xff]  ;;  %v5346_v23 = vld [vmem:[#allocation7_spill] sm:$0xff]  ;;  %v5347_v9 = vld [vmem:[#allocation8_spill] sm:$0xff] }
 0x363   :  { %v5133_v57 = vadd.f32 %v5027_v37, %v2912_v51 }
 0x422   :  { %v3962_v43 = vpop.f32.mrf.mxu1 }
 0x424   :  { %v2526_v55 = vpop.f32.mrf.mxu1 }
 0x426   :  { %v3963_v5 = vpop.f32.mrf.mxu1 }
 0x428   :  { %v2529_v0 = vpop.f32.mrf.mxu1 }
 0x429   :  { %v2541_v27 = vadd.f32 %v2529_v0, %v2526_v55 }
 0x42b   :  { %v2542_v22 = vadd.f32 %v3962_v43, %v2541_v27  ;;  %v5148_v27 = vadd.f32 %v2912_v51, %v5347_v9 }
 0x42d   :  { %v2543_v12 = vadd.f32 %v3963_v5, %v2542_v22  ;;  %v5348_v22 = vld [vmem:[#allocation9_spill] sm:$0xff] }
 0x42e   :  { %v5152_v37 = vadd.f32 %v5348_v22, %v2912_v51 }
 0x42f   :  { %v2544_v15 = vrot.slane %v2543_v12, 4 }
 0x431   :  { %v2545_v13 = vadd.f32 %v2544_v15, %v2543_v12  ;;  %v5349_v12 = vld [vmem:[#allocation10_spill] sm:$0xff] }
 0x432   :  { %v5155_v15 = vadd.f32 %v2912_v51, %v5349_v12 }
 0x433   :  { %v2546_v18 = vrot.slane %v2545_v13, 2 }
 0x435   :  { %v2547_v8 = vadd.f32 %v2546_v18, %v2545_v13  ;;  %v5350_v13 = vld [vmem:[#allocation11_spill] sm:$0xff] }
 0x436   :  { %v5158_v18 = vadd.f32 %v5350_v13, %v2912_v51 }
 0x437   :  { %v2548_v42 = vrot.slane %v2547_v8, 1 }
 0x439   :  { %v2549_v53 = vadd.f32 %v2548_v42, %v2547_v8  ;;  %v5351_v8 = vld [vmem:[#allocation12_spill] sm:$0xff] }
 0x43a   :  { %v5161_v42 = vadd.f32 %v2912_v51, %v5351_v8 }
 0x43b   :  { %v2550_v59 = vmul.f32 0.03125, %v2549_v53  ;;  %v3185_v53 = vld [vmem:[%s5324_s9] ss:$0 sm:$0xff] }
 0x43d   :  { %v2551_v63 = vsub.f32 %v2526_v55, %v2550_v59  ;;  %v2552_v33 = vsub.f32 %v2529_v0, %v2550_v59  ;;  %v2553_v49 = vsub.f32 %v3962_v43, %v2550_v59  ;;  %v2554_v58 = vsub.f32 %v3963_v5, %v2550_v59 }
 0x43e   :  { %v5136_v43 = vadd.f32 %v2912_v51, %v5343_v6  ;;  %v5139_v55 = vadd.f32 %v5344_v61, %v2912_v51  ;;  %v5142_v5 = vadd.f32 %v2912_v51, %v5345_v16  ;;  %v5145_v0 = vadd.f32 %v5346_v23, %v2912_v51 }
 0x43f   :  { %v2555_v36 = vmul.f32 %v2551_v63, %v2551_v63  ;;  %v2556_v60 = vmul.f32 %v2552_v33, %v2552_v33  ;;  %v2557_v56 = vmul.f32 %v2553_v49, %v2553_v49  ;;  %v2558_v4 = vmul.f32 %v2554_v58, %v2554_v58 }
 0x441   :  { %v2559_v41 = vadd.f32 %v2556_v60, %v2555_v36 }
 0x443   :  { %v2560_v1 = vadd.f32 %v2559_v41, %v2557_v56  ;;  %v5352_v56 = vld [vmem:[#allocation13_spill] sm:$0xff] }
 0x444   :  { %v5167_v41 = vadd.f32 %v5352_v56, %v2912_v51 }
 0x445   :  { %v2561_v39 = vadd.f32 %v2560_v1, %v2558_v4  ;;  %v5353_v4 = vld [vmem:[#allocation14_spill] sm:$0xff] }
 0x446   :  { %v5170_v1 = vadd.f32 %v2912_v51, %v5353_v4 }
 0x447   :  { %v2562_v7 = vrot.slane %v2561_v39, 4 }
 0x449   :  { %v2563_v17 = vadd.f32 %v2562_v7, %v2561_v39  ;;  %v5354_v39 = vld [vmem:[#allocation15_spill] sm:$0xff] }
 0x44a   :  { %v5173_v7 = vadd.f32 %v5354_v39, %v2912_v51 }
 0x44b   :  { %v2564_v34 = vrot.slane %v2563_v17, 2 }
 0x44d   :  { %v2565_v32 = vadd.f32 %v2564_v34, %v2563_v17  ;;  %v5355_v17 = vld [vmem:[#allocation16_spill] sm:$0xff] }
 0x44e   :  { %v5176_v34 = vadd.f32 %v2912_v51, %v5355_v17 }
 0x44f   :  { %v2566_v62 = vrot.slane %v2565_v32, 1 }
 0x451   :  { %v2567_v44 = vadd.f32 %v2566_v62, %v2565_v32 }
 0x453   :  { %v2568_v46 = vmul.f32 0.03125, %v2567_v44  ;;  %v5357_v44 = vld [vmem:[#allocation18_spill] sm:$0xff] }
 0x455   :  { %v2570_v3 = vadd.f32 1e-05, %v2568_v46  ;;  %v5190_v46 = vadd.f32 %v2912_v51, %v5357_v44 }
 0x457   :  { %4100 = vrsqrt.f32 %v2570_v3  ;;  %v5358_v3 = vld [vmem:[#allocation19_spill] sm:$0xff] }
 0x464   :  { %v4101_v11 = vpop.eup %4100 }
 0x465   :  { %v2572_v21 = vmul.f32 %v4101_v11, %v2569_v47  ;;  %v5193_v47 = vadd.f32 %v5358_v3, %v2912_v51  ;;  %v5359_v11 = vld [vmem:[#allocation20_spill] sm:$0xff] }
 0x467   :  { %v2577_v48 = vrot.slane %v2572_v21, %v4710_v2  ;;  %v5196_v21 = vadd.f32 %v2912_v51, %v5359_v11 }
 0x469   :  { %v2579_v59 = vmul.f32 %v2577_v48, %v2551_v63  ;;  %v2580_v36 = vmul.f32 %v2577_v48, %v2552_v33  ;;  %v2581_v60 = vmul.f32 %v2577_v48, %v2553_v49  ;;  %v2582_v2 = vmul.f32 %v2577_v48, %v2554_v58  ;;  %v5356_v49 = vld [vmem:[#allocation17_spill] sm:$0xff] }
 0x46a   :  { %v5187_v58 = vadd.f32 %v5356_v49, %v2912_v51 }
 0x46b   :  { %v5178_v32 = vadd.f32 %v3185_v53, %v2579_v59  ;;  %v5180_v62 = vadd.f32 %v3185_v53, %v2580_v36  ;;  %v5182_v63 = vadd.f32 %v3185_v53, %v2581_v60  ;;  %v5184_v33 = vadd.f32 %v3185_v53, %v2582_v2 }
 0x46d   :  { %v2598_v6 = vadd.f32 %v5178_v32, %v533_v14  ;;  %v2599_v61 = vadd.f32 %v5180_v62, %v536_v54  ;;  %v2600_v16 = vadd.f32 %v5182_v63, %v541_v24  ;;  %v2601_v23 = vadd.f32 %v5184_v33, %v544_v30 }
 0x46e   :  { %v2630_v9 = vadd.f32 %v5178_v32, %v549_v38  ;;  %v2631_v48 = vadd.f32 %v5180_v62, %v552_v20  ;;  %v2632_v22 = vadd.f32 %v5182_v63, %v557_v25  ;;  %v2633_v12 = vadd.f32 %v5184_v33, %v560_v10 }
 0x46f   :  { %v2602_v13 = vmax.f32 %v2598_v6, 0.0  ;;  %v2603_v8 = vmax.f32 %v2599_v61, 0.0  ;;  %v2604_v51 = vmax.f32 %v2600_v16, 0.0  ;;  %v2605_v53 = vmax.f32 %v2601_v23, 0.0 }
 0x470   :  { %v2634_v59 = vmax.f32 %v2630_v9, 0.0  ;;  %v2635_v14 = vmax.f32 %v2631_v48, 0.0  ;;  %v2636_v36 = vmax.f32 %v2632_v22, 0.0  ;;  %v2637_v54 = vmax.f32 %v2633_v12, 0.0 }
 0x471   :  { %v3387_v60 = vpack.c.bf16 %v2603_v8, %v2602_v13  ;;  %v3392_v24 = vpack.c.bf16 %v2605_v53, %v2604_v51  ;;  %v2662_v30 = vadd.f32 %v5178_v32, %v565_v40  ;;  %v2663_v38 = vadd.f32 %v5180_v62, %v568_v29 }
 0x472   :  { %v3397_v2 = vpack.c.bf16 %v2635_v14, %v2634_v59  ;;  %v3402_v20 = vpack.c.bf16 %v2637_v54, %v2636_v36  ;;  %v2664_v25 = vadd.f32 %v5182_v63, %v5109_v19  ;;  %v2665_v10 = vadd.f32 %v5184_v33, %v576_v26 }
 0x473   :  { %3388 = vst [vmem:[%s5325_s12] sm:$0xff] %v3387_v60   ;;  %3491 = vst [vmem:[%s5325_s12 + $0x8] sm:$0xff] %v3392_v24   ;;  %v2666_v56 = vmax.f32 %v2662_v30, 0.0  ;;  %v2667_v4 = vmax.f32 %v2663_v38, 0.0  ;;  %v2694_v40 = vadd.f32 %v5178_v32, %v5118_v45  ;;  %v2695_v29 = vadd.f32 %v5180_v62, %v5124_v52 }
 0x474   :  { %3492 = vst [vmem:[%s5325_s12 + $0x10] sm:$0xff] %v3397_v2   ;;  %3493 = vst [vmem:[%s5325_s12 + $0x18] sm:$0xff] %v3402_v20   ;;  %v2668_v19 = vmax.f32 %v2664_v25, 0.0  ;;  %v2669_v26 = vmax.f32 %v2665_v10, 0.0  ;;  %v2696_v39 = vadd.f32 %v5182_v63, %v5115_v31  ;;  %v2697_v17 = vadd.f32 %v5184_v33, %v5121_v28 }
 0x475   :  { %v3407_v45 = vpack.c.bf16 %v2667_v4, %v2666_v56  ;;  %v2698_v49 = vmax.f32 %v2694_v40, 0.0  ;;  %v2699_v44 = vmax.f32 %v2695_v29, 0.0  ;;  %v2726_v52 = vadd.f32 %v5178_v32, %v5130_v50 }
 0x476   :  { %v3412_v3 = vpack.c.bf16 %v2669_v26, %v2668_v19  ;;  %v2700_v11 = vmax.f32 %v2696_v39, 0.0  ;;  %v2701_v6 = vmax.f32 %v2697_v17, 0.0  ;;  %v2727_v61 = vadd.f32 %v5180_v62, %v5136_v43 }
 0x477   :  { %3494 = vst [vmem:[%s5325_s12 + $0x20] sm:$0xff] %v3407_v45   ;;  %v3417_v31 = vpack.c.bf16 %v2699_v44, %v2698_v49  ;;  %v2728_v28 = vadd.f32 %v5182_v63, %v5127_v35  ;;  %v2729_v16 = vadd.f32 %v5184_v33, %v5133_v57  ;;  %v2730_v23 = vmax.f32 %v2726_v52, 0.0 }
 0x478   :  { %3495 = vst [vmem:[%s5325_s12 + $0x28] sm:$0xff] %v3412_v3   ;;  %v3422_v50 = vpack.c.bf16 %v2701_v6, %v2700_v11  ;;  %v2731_v9 = vmax.f32 %v2727_v61, 0.0  ;;  %v2758_v43 = vadd.f32 %v5178_v32, %v5142_v5  ;;  %v2759_v48 = vadd.f32 %v5180_v62, %v5148_v27 }
 0x479   :  { %3496 = vst [vmem:[%s5325_s12 + $0x30] sm:$0xff] %v3417_v31   ;;  %v2732_v35 = vmax.f32 %v2728_v28, 0.0  ;;  %v2733_v22 = vmax.f32 %v2729_v16, 0.0  ;;  %v2760_v57 = vadd.f32 %v5182_v63, %v5139_v55  ;;  %v2761_v12 = vadd.f32 %v5184_v33, %v5145_v0 }
 0x47a   :  { %3497 = vst [vmem:[%s5325_s12 + $0x38] sm:$0xff] %v3422_v50   ;;  %v3427_v5 = vpack.c.bf16 %v2731_v9, %v2730_v23  ;;  %v2762_v13 = vmax.f32 %v2758_v43, 0.0  ;;  %v2763_v8 = vmax.f32 %v2759_v48, 0.0  ;;  %v2790_v27 = vadd.f32 %v5178_v32, %v5155_v15 }
 0x47b   :  { %v3432_v51 = vpack.c.bf16 %v2733_v22, %v2732_v35  ;;  %v2764_v53 = vmax.f32 %v2760_v57, 0.0  ;;  %v2765_v59 = vmax.f32 %v2761_v12, 0.0  ;;  %v2791_v14 = vadd.f32 %v5180_v62, %v5161_v42 }
 0x47c   :  { %3498 = vst [vmem:[%s5325_s12 + $0x40] sm:$0xff] %v3427_v5   ;;  %v3437_v55 = vpack.c.bf16 %v2763_v8, %v2762_v13  ;;  %v2792_v0 = vadd.f32 %v5182_v63, %v5152_v37  ;;  %v2793_v36 = vadd.f32 %v5184_v33, %v5158_v18  ;;  %v2794_v54 = vmax.f32 %v2790_v27, 0.0 }
 0x47d   :  { %3499 = vst [vmem:[%s5325_s12 + $0x48] sm:$0xff] %v3432_v51   ;;  %v3442_v15 = vpack.c.bf16 %v2765_v59, %v2764_v53  ;;  %v2795_v60 = vmax.f32 %v2791_v14, 0.0  ;;  %v2822_v42 = vadd.f32 %v5178_v32, %v5170_v1  ;;  %v2823_v24 = vadd.f32 %v5180_v62, %v5176_v34 }
 0x47e   :  { %3500 = vst [vmem:[%s5325_s12 + $0x50] sm:$0xff] %v3437_v55   ;;  %v2796_v37 = vmax.f32 %v2792_v0, 0.0  ;;  %v2797_v30 = vmax.f32 %v2793_v36, 0.0  ;;  %v2824_v18 = vadd.f32 %v5182_v63, %v5167_v41  ;;  %v2825_v38 = vadd.f32 %v5184_v33, %v5173_v7 }
 0x47f   :  { %3501 = vst [vmem:[%s5325_s12 + $0x58] sm:$0xff] %v3442_v15   ;;  %v3447_v1 = vpack.c.bf16 %v2795_v60, %v2794_v54  ;;  %v2826_v2 = vmax.f32 %v2822_v42, 0.0  ;;  %v2827_v20 = vmax.f32 %v2823_v24, 0.0  ;;  %v2854_v34 = vadd.f32 %v5178_v32, %v5190_v46 }
 0x480   :  { %v3452_v25 = vpack.c.bf16 %v2797_v30, %v2796_v37  ;;  %v2828_v10 = vmax.f32 %v2824_v18, 0.0  ;;  %v2829_v56 = vmax.f32 %v2825_v38, 0.0  ;;  %v2855_v4 = vadd.f32 %v5180_v62, %v5196_v21 }
 0x481   :  { %3502 = vst [vmem:[%s5325_s12 + $0x60] sm:$0xff] %v3447_v1   ;;  %v3457_v41 = vpack.c.bf16 %v2827_v20, %v2826_v2  ;;  %v2856_v7 = vadd.f32 %v5182_v63, %v5187_v58  ;;  %v2857_v40 = vadd.f32 %v5184_v33, %v5193_v47  ;;  %v2858_v29 = vmax.f32 %v2854_v34, 0.0 }
 0x482   :  { %3503 = vst [vmem:[%s5325_s12 + $0x68] sm:$0xff] %v3452_v25   ;;  %v3462_v32 = vpack.c.bf16 %v2829_v56, %v2828_v10  ;;  %v2859_v46 = vmax.f32 %v2855_v4, 0.0 }
 0x483   :  { %3504 = vst [vmem:[%s5325_s12 + $0x70] sm:$0xff] %v3457_v41   ;;  %v2860_v62 = vmax.f32 %v2856_v7, 0.0  ;;  %v2861_v21 = vmax.f32 %v2857_v40, 0.0 }
 0x484   :  { %3505 = vst [vmem:[%s5325_s12 + $0x78] sm:$0xff] %v3462_v32   ;;  %v3467_v63 = vpack.c.bf16 %v2859_v46, %v2858_v29 }
 0x485   :  { %v3472_v58 = vpack.c.bf16 %v2861_v21, %v2860_v62 }
 0x486   :  { %3506 = vst [vmem:[%s5325_s12 + $0x80] sm:$0xff] %v3467_v63  }
 0x487   :  { %3507 = vst [vmem:[%s5325_s12 + $0x88] sm:$0xff] %v3472_v58  }

</bundles_post_ra>
